<compile_context>
chip_gen: v6e
topology: v6e:2x2x1
jax: 0.10.0
libtpu: 0.0.40
codegen_flags: <defaults>
</compile_context>

<pallas_src>
import functools

import jax
import jax.numpy as jnp
from jax.experimental import pallas as pl
from jax.experimental.pallas import tpu as pltpu


def _round_up(x, m):
    return ((x + m - 1) // m) * m


def _reservoir_kernel(x_ref, win_ref, w_ref,
                      spk_out_ref, mem_out_ref, spk_sum_ref,
                      v_scr, s_scr,
                      *, beta, threshold, reset_mechanism, tt, t_real, mask_time):
    t_blk = pl.program_id(1)   # time-block axis (innermost, sequential)

    # Reset carried state and the per-batch-block spike-count accumulator at the
    # first time block of each batch block.
    @pl.when(t_blk == 0)
    def _():
        v_scr[...] = jnp.zeros_like(v_scr)
        s_scr[...] = jnp.zeros_like(s_scr)
        spk_sum_ref[...] = jnp.zeros_like(spk_sum_ref)

    # Input current for the whole time block, computed once:
    #   i_in[tl, b, n] = x[tl, b] * w_in[n]        (nn.Linear(1, N, bias=False))
    x_blk = x_ref[0]                                            # (TT, TB)
    i_in_blk = x_blk[:, :, None] * win_ref[...][None, :, :]     # (TT, TB, N)

    v = v_scr[...]            # (TB, N) float32
    s = s_scr[...]            # (TB, N) matmul dtype (f32 or bf16)
    base_t = t_blk * tt

    for tl in range(tt):      # unrolled recurrence within the block
        # Recurrent current: Spk @ W on the MXU, f32 accumulate.
        i_rec = jnp.dot(s, w_ref[...], preferred_element_type=jnp.float32)
        v = beta * v + i_in_blk[tl] + i_rec
        spk = (v >= threshold).astype(jnp.float32)

        if reset_mechanism == "zero":
            v = v * (1.0 - spk)
        elif reset_mechanism == "subtract":
            v = v - spk * threshold
        elif reset_mechanism == "none":
            pass
        else:
            raise ValueError(
                "Invalid reset mechanism. Choose 'zero', 'subtract', or 'none'.")

        spk_out_ref[tl] = spk.astype(spk_out_ref.dtype)
        mem_out_ref[tl] = v

        # In-kernel firing-rate accumulation (mask out padded time steps).
        if mask_time:
            spk_sum_ref[...] += spk * (base_t + tl < t_real).astype(jnp.float32)
        else:
            spk_sum_ref[...] += spk

        s = spk.astype(s_scr.dtype)

    v_scr[...] = v
    s_scr[...] = s


def spiking_reservoir_forward(x_btl, w_in, W, *, threshold, beta_reservoir,
                              reset_mechanism="zero", time_block=8,
                              batch_block=8, matmul_dtype=jnp.float32):
    """Pallas equivalent of SpikingReservoirLoaded.forward.

    Args:
      x_btl: (batch, time_steps, 1) float32  (PyTorch input convention)
      w_in:  (reservoir_size, 1)    float32  (nn.Linear(1, N).weight)
      W:     (reservoir_size, reservoir_size) float32
      matmul_dtype: dtype for W and the spike carry in the S @ W matmul
        (jnp.float32 = exact module semantics; jnp.bfloat16 halves W's
         VMEM/HBM footprint and runs the MXU at native bf16 rate).

    Returns:
      avg_firing_rate: scalar float32
      spike_record:    (time_steps, batch, reservoir_size) bfloat16 (values are
                       exactly {0, 1})
      mem_record:      (time_steps, batch, reservoir_size) float32
    """
    B, T, _ = x_btl.shape
    N = W.shape[0]

    TT = _round_up(max(int(time_block), 1), 8)    # time steps per grid step
    TB = _round_up(max(int(batch_block), 1), 8)   # batch rows per grid step
    B_pad = _round_up(B, TB)
    N_pad = _round_up(N, 128)
    T_pad = _round_up(T, TT)
    n_bblk = B_pad // TB
    n_tblk = T_pad // TT

    # (B, T, 1) -> (T, B), zero-pad, regroup as (batch_blocks, T_pad, TB) so the
    # last block dim is always the full array extent (lane-legal).
    x_tb = jnp.transpose(x_btl[..., 0], (1, 0)).astype(jnp.float32)
    x_tb = jnp.pad(x_tb, ((0, T_pad - T), (0, B_pad - B)))
    x_r = jnp.transpose(x_tb.reshape(T_pad, n_bblk, TB), (1, 0, 2))

    win_row = jnp.pad(w_in[:, 0].astype(jnp.float32), (0, N_pad - N))
    win_row = win_row.reshape(1, N_pad)

    W_pad = jnp.pad(W.astype(jnp.float32),
                    ((0, N_pad - N), (0, N_pad - N))).astype(matmul_dtype)

    kernel = functools.partial(
        _reservoir_kernel,
        beta=float(beta_reservoir),
        threshold=float(threshold),
        reset_mechanism=reset_mechanism,
        tt=TT,
        t_real=T,
        mask_time=(T_pad != T),
    )

    spk_full, mem_full, spk_sum = pl.pallas_call(
        kernel,
        out_shape=(
            # spikes are exactly {0,1} -> bf16 record halves writeback traffic
            jax.ShapeDtypeStruct((T_pad, B_pad, N_pad), jnp.bfloat16),
            jax.ShapeDtypeStruct((T_pad, B_pad, N_pad), jnp.float32),
            jax.ShapeDtypeStruct((B_pad, N_pad), jnp.float32),   # spike counts
        ),
        grid_spec=pltpu.PrefetchScalarGridSpec(
            num_scalar_prefetch=0,
            grid=(n_bblk, n_tblk),
            in_specs=[
                # x: pipelined per (batch, time) block
                pl.BlockSpec((1, TT, TB), lambda b, t: (b, t, 0)),
                # w_in, W: whole-array VMEM residents, single copy (no
                # double-buffering of the N x N recurrent weight).
                pl.BlockSpec(memory_space=pltpu.MemorySpace.VMEM),
                pl.BlockSpec(memory_space=pltpu.MemorySpace.VMEM),
            ],
            out_specs=[
                pl.BlockSpec((TT, TB, N_pad), lambda b, t: (t, b, 0)),
                pl.BlockSpec((TT, TB, N_pad), lambda b, t: (t, b, 0)),
                pl.BlockSpec((TB, N_pad), lambda b, t: (b, 0)),  # accumulator
            ],
            scratch_shapes=[
                pltpu.VMEM((TB, N_pad), jnp.float32),    # V_mem carry
                pltpu.VMEM((TB, N_pad), matmul_dtype),   # Spk carry
            ],
        ),
        compiler_params=pltpu.CompilerParams(
            # batch blocks are independent (v7x: split across TensorCores),
            # time recurrence is sequential.
            dimension_semantics=("parallel", "arbitrary"),
            vmem_limit_bytes=64 * 1024 * 1024,
        ),
    )(x_r, win_row, W_pad)

    spike_rec = spk_full[:T, :B, :N]   # bfloat16, values exactly {0, 1}
    mem_rec = mem_full[:T, :B, :N]
    avg_firing_rate = jnp.sum(spk_sum[:B, :N]) / (T * B * N)
    return avg_firing_rate, spike_rec, mem_rec


def _reference_forward(x_btl, w_in, W, *, threshold, beta_reservoir,
                       reset_mechanism="zero"):
    """Pure-JAX reference mirroring the PyTorch loop (float32 throughout)."""
    B, T, _ = x_btl.shape
    N = W.shape[0]
    V = jnp.zeros((B, N), jnp.float32)
    S = jnp.zeros((B, N), jnp.float32)

    def step(carry, x_t):
        V, S = carry
        i_in = x_t @ w_in.T                  # (B,1) @ (1,N) -> (B,N)
        i_rec = S @ W
        v_new = beta_reservoir * V + i_in + i_rec
        s_new = (v_new >= threshold).astype(jnp.float32)
        if reset_mechanism == "zero":
            v_new = v_new * (1.0 - s_new)
        elif reset_mechanism == "subtract":
            v_new = v_new - s_new * threshold
        elif reset_mechanism == "none":
            pass
        else:
            raise ValueError(
                "Invalid reset mechanism. Choose 'zero', 'subtract', or 'none'.")
        return (v_new, s_new), (s_new, v_new)

    (_, _), (spk_rec, mem_rec) = jax.lax.scan(
        step, (V, S), jnp.transpose(x_btl, (1, 0, 2)))
    return jnp.mean(spk_rec), spk_rec, mem_rec


if __name__ == "__main__":
    # Small, deterministic example consistent with the module.
    batch_size = 4          # padded to 8 (sublane tile) inside the wrapper
    time_steps = 20         # padded to 24 (3 time blocks of 8) inside
    reservoir_size = 128    # already lane-dense (multiple of 128)
    threshold = 1.0
    beta_reservoir = 0.9

    key = jax.random.PRNGKey(0)
    kx, kw, kwin = jax.random.split(key, 3)

    x = jax.random.uniform(kx, (batch_size, time_steps, 1), jnp.float32,
                           minval=0.0, maxval=2.0)
    # Deterministic synthetic "loaded" weights (the original reads .npy files).
    W = 0.1 * jax.random.normal(kw, (reservoir_size, reservoir_size), jnp.float32)
    w_in = jax.random.normal(kwin, (reservoir_size, 1), jnp.float32)

    # Exact (float32) path, checked against the PyTorch-style reference.
    for reset in ("zero", "subtract"):
        avg_rate, spk_rec, mem_rec = spiking_reservoir_forward(
            x, w_in, W,
            threshold=threshold,
            beta_reservoir=beta_reservoir,
            reset_mechanism=reset,
        )
        jax.block_until_ready((avg_rate, spk_rec, mem_rec))

        ref_rate, ref_spk, ref_mem = _reference_forward(
            x, w_in, W,
            threshold=threshold,
            beta_reservoir=beta_reservoir,
            reset_mechanism=reset,
        )
        assert spk_rec.shape == (time_steps, batch_size, reservoir_size)
        assert mem_rec.shape == (time_steps, batch_size, reservoir_size)
        assert jnp.allclose(spk_rec.astype(jnp.float32), ref_spk, atol=1e-5)
        assert jnp.allclose(mem_rec, ref_mem, atol=1e-4)
        assert jnp.allclose(avg_rate, ref_rate, atol=1e-5)

    # bf16 recurrent-weight path (halved VMEM/HBM for W, native MXU bf16 rate).
    # Spiking is a hard nonlinearity, so only shape/finiteness is asserted here.
    avg_bf16, spk_bf16, mem_bf16 = spiking_reservoir_forward(
        x, w_in, W,
        threshold=threshold,
        beta_reservoir=beta_reservoir,
        reset_mechanism="zero",
        matmul_dtype=jnp.bfloat16,
    )
    jax.block_until_ready((avg_bf16, spk_bf16, mem_bf16))
    assert spk_bf16.shape == (time_steps, batch_size, reservoir_size)
    assert bool(jnp.isfinite(mem_bf16).all())

    print("KERNEL_OK")
</pallas_src>

<mosaic_0001>
module attributes {stable_mosaic.version = 11 : i64} {
  func.func @_reservoir_kernel(%arg0: i32, %arg1: i32, %arg2: memref<1x8x8xf32, #tpu.memory_space<vmem>>, %arg3: memref<1x128xf32, #tpu.memory_space<vmem>>, %arg4: memref<128x128xf32, #tpu.memory_space<vmem>>, %arg5: memref<8x8x128xbf16, #tpu.memory_space<vmem>>, %arg6: memref<8x8x128xf32, #tpu.memory_space<vmem>>, %arg7: memref<8x128xf32, #tpu.memory_space<vmem>>, %arg8: memref<8x128xf32, #tpu.memory_space<vmem>>, %arg9: memref<8x128xf32, #tpu.memory_space<vmem>>) attributes {dimension_semantics = [#tpu.dimension_semantics<parallel>, #tpu.dimension_semantics<arbitrary>], iteration_bounds = array<i64: 1, 3>, scalar_prefetch = 0 : i64, scratch_operands = 2 : i64, tpu.core_type = #tpu.core_type<tc>, window_params = [{transform_indices = @transform_0, window_bounds = array<i64: 1, 8, 8>}, {pipeline_mode = #tpu.pipeline_mode<synchronous>, transform_indices = @transform_1, window_bounds = array<i64: 1, 128>}, {pipeline_mode = #tpu.pipeline_mode<synchronous>, transform_indices = @transform_2, window_bounds = array<i64: 128, 128>}, {transform_indices = @transform_3, window_bounds = array<i64: 8, 8, 128>}, {transform_indices = @transform_4, window_bounds = array<i64: 8, 8, 128>}, {transform_indices = @transform_5, window_bounds = array<i64: 8, 128>}]} {
    %c0_i32 = arith.constant 0 : i32
    %0 = arith.cmpi eq, %arg1, %c0_i32 : i32
    %1 = arith.extui %0 : i1 to i32
    %c0_i32_0 = arith.constant 0 : i32
    %2 = arith.cmpi ne, %1, %c0_i32_0 : i32
    scf.if %2 {
      %cst_141 = arith.constant 0.000000e+00 : f32
      %264 = vector.broadcast %cst_141 : f32 to vector<8x128xf32>
      %c0_142 = arith.constant 0 : index
      %c0_143 = arith.constant 0 : index
      %265 = vector.load %arg8[%c0_142, %c0_143] : memref<8x128xf32, #tpu.memory_space<vmem>>, vector<8x128xf32>
      tpu.vector_store %arg8[%c0_142, %c0_143], %264 {strides = array<i32>} : memref<8x128xf32, #tpu.memory_space<vmem>>, vector<8x128xf32>,
      %cst_144 = arith.constant 0.000000e+00 : f32
      %266 = vector.broadcast %cst_144 : f32 to vector<8x128xf32>
      %c0_145 = arith.constant 0 : index
      %c0_146 = arith.constant 0 : index
      %267 = vector.load %arg9[%c0_145, %c0_146] : memref<8x128xf32, #tpu.memory_space<vmem>>, vector<8x128xf32>
      tpu.vector_store %arg9[%c0_145, %c0_146], %266 {strides = array<i32>} : memref<8x128xf32, #tpu.memory_space<vmem>>, vector<8x128xf32>,
      %cst_147 = arith.constant 0.000000e+00 : f32
      %268 = vector.broadcast %cst_147 : f32 to vector<8x128xf32>
      %c0_148 = arith.constant 0 : index
      %c0_149 = arith.constant 0 : index
      %269 = vector.load %arg7[%c0_148, %c0_149] : memref<8x128xf32, #tpu.memory_space<vmem>>, vector<8x128xf32>
      tpu.vector_store %arg7[%c0_148, %c0_149], %268 {strides = array<i32>} : memref<8x128xf32, #tpu.memory_space<vmem>>, vector<8x128xf32>,
    } else {
    }
    %c0 = arith.constant 0 : index
    %c0_1 = arith.constant 0 : index
    %c0_2 = arith.constant 0 : index
    %3 = vector.load %arg2[%c0, %c0_1, %c0_2] : memref<1x8x8xf32, #tpu.memory_space<vmem>>, vector<1x8x8xf32>
    %4 = vector.shape_cast %3 : vector<1x8x8xf32> to vector<8x8xf32>
    %5 = vector.shape_cast %4 : vector<8x8xf32> to vector<8x8x1xf32>
    %c0_3 = arith.constant 0 : index
    %c0_4 = arith.constant 0 : index
    %6 = vector.load %arg3[%c0_3, %c0_4] : memref<1x128xf32, #tpu.memory_space<vmem>>, vector<1x128xf32>
    %7 = vector.shape_cast %6 : vector<1x128xf32> to vector<1x1x128xf32>
    %8 = vector.broadcast %5 : vector<8x8x1xf32> to vector<8x8x128xf32>
    %9 = vector.broadcast %7 : vector<1x1x128xf32> to vector<8x8x128xf32>
    %10 = arith.mulf %8, %9 : vector<8x8x128xf32>
    %c0_5 = arith.constant 0 : index
    %c0_6 = arith.constant 0 : index
    %11 = vector.load %arg8[%c0_5, %c0_6] : memref<8x128xf32, #tpu.memory_space<vmem>>, vector<8x128xf32>
    %c0_7 = arith.constant 0 : index
    %c0_8 = arith.constant 0 : index
    %12 = vector.load %arg9[%c0_7, %c0_8] : memref<8x128xf32, #tpu.memory_space<vmem>>, vector<8x128xf32>
    %c8_i32 = arith.constant 8 : i32
    %13 = arith.muli %arg1, %c8_i32 : i32
    %c0_9 = arith.constant 0 : index
    %c0_10 = arith.constant 0 : index
    %14 = vector.load %arg4[%c0_9, %c0_10] : memref<128x128xf32, #tpu.memory_space<vmem>>, vector<128x128xf32>
    %cst = arith.constant dense<0.000000e+00> : vector<8x128xf32>
    %15 = tpu.matmul %12, %14, %cst {dimension_numbers = #tpu.dot_dimension_numbers<[1], [0], [0], [1], [0, 0, 1, 1], [], []>} : vector<8x128xf32>, vector<128x128xf32>, vector<8x128xf32> -> vector<8x128xf32>
    %cst_11 = arith.constant 0.899999976 : f32
    %16 = vector.broadcast %cst_11 : f32 to vector<8x128xf32>
    %17 = arith.mulf %16, %11 : vector<8x128xf32>
    %18 = vector.extract_strided_slice %10 {offsets = [0, 0, 0], sizes = [1, 8, 128], strides = [1, 1, 1]} : vector<8x8x128xf32> to vector<1x8x128xf32>
    %19 = vector.shape_cast %18 : vector<1x8x128xf32> to vector<8x128xf32>
    %20 = arith.addf %17, %19 : vector<8x128xf32>
    %21 = arith.addf %20, %15 : vector<8x128xf32>
    %cst_12 = arith.constant 1.000000e+00 : f32
    %22 = vector.broadcast %cst_12 : f32 to vector<8x128xf32>
    %23 = arith.cmpf oge, %21, %22 : vector<8x128xf32>
    %24 = arith.extui %23 : vector<8x128xi1> to vector<8x128xi32>
    %25 = arith.sitofp %24 : vector<8x128xi32> to vector<8x128xf32>
    %cst_13 = arith.constant 1.000000e+00 : f32
    %26 = vector.broadcast %cst_13 : f32 to vector<8x128xf32>
    %27 = arith.subf %26, %25 : vector<8x128xf32>
    %28 = arith.mulf %21, %27 : vector<8x128xf32>
    %29 = arith.truncf %25 : vector<8x128xf32> to vector<8x128xbf16>
    %c0_14 = arith.constant 0 : index
    %c0_15 = arith.constant 0 : index
    %c0_16 = arith.constant 0 : index
    %30 = vector.load %arg5[%c0_14, %c0_15, %c0_16] : memref<8x8x128xbf16, #tpu.memory_space<vmem>>, vector<1x8x128xbf16>
    %31 = vector.shape_cast %30 : vector<1x8x128xbf16> to vector<8x128xbf16>
    %32 = vector.shape_cast %29 : vector<8x128xbf16> to vector<1x8x128xbf16>
    tpu.vector_store %arg5[%c0_14, %c0_15, %c0_16], %32 {strides = array<i32>} : memref<8x8x128xbf16, #tpu.memory_space<vmem>>, vector<1x8x128xbf16>,
    %c0_17 = arith.constant 0 : index
    %c0_18 = arith.constant 0 : index
    %c0_19 = arith.constant 0 : index
    %33 = vector.load %arg6[%c0_17, %c0_18, %c0_19] : memref<8x8x128xf32, #tpu.memory_space<vmem>>, vector<1x8x128xf32>
    %34 = vector.shape_cast %33 : vector<1x8x128xf32> to vector<8x128xf32>
    %35 = vector.shape_cast %28 : vector<8x128xf32> to vector<1x8x128xf32>
    tpu.vector_store %arg6[%c0_17, %c0_18, %c0_19], %35 {strides = array<i32>} : memref<8x8x128xf32, #tpu.memory_space<vmem>>, vector<1x8x128xf32>,
    %c0_20 = arith.constant 0 : index
    %c0_21 = arith.constant 0 : index
    %36 = vector.load %arg7[%c0_20, %c0_21] : memref<8x128xf32, #tpu.memory_space<vmem>>, vector<8x128xf32>
    %c0_i32_22 = arith.constant 0 : i32
    %37 = arith.addi %13, %c0_i32_22 : i32
    %c20_i32 = arith.constant 20 : i32
    %38 = arith.cmpi slt, %37, %c20_i32 : i32
    %39 = arith.extui %38 : i1 to i32
    %40 = arith.sitofp %39 : i32 to f32
    %41 = vector.broadcast %40 : f32 to vector<8x128xf32>
    %42 = arith.mulf %25, %41 : vector<8x128xf32>
    %43 = arith.addf %36, %42 : vector<8x128xf32>
    %c0_23 = arith.constant 0 : index
    %c0_24 = arith.constant 0 : index
    %44 = vector.load %arg7[%c0_23, %c0_24] : memref<8x128xf32, #tpu.memory_space<vmem>>, vector<8x128xf32>
    tpu.vector_store %arg7[%c0_23, %c0_24], %43 {strides = array<i32>} : memref<8x128xf32, #tpu.memory_space<vmem>>, vector<8x128xf32>,
    %c0_25 = arith.constant 0 : index
    %c0_26 = arith.constant 0 : index
    %45 = vector.load %arg4[%c0_25, %c0_26] : memref<128x128xf32, #tpu.memory_space<vmem>>, vector<128x128xf32>
    %cst_27 = arith.constant dense<0.000000e+00> : vector<8x128xf32>
    %46 = tpu.matmul %25, %45, %cst_27 {dimension_numbers = #tpu.dot_dimension_numbers<[1], [0], [0], [1], [0, 0, 1, 1], [], []>} : vector<8x128xf32>, vector<128x128xf32>, vector<8x128xf32> -> vector<8x128xf32>
    %cst_28 = arith.constant 0.899999976 : f32
    %47 = vector.broadcast %cst_28 : f32 to vector<8x128xf32>
    %48 = arith.mulf %47, %28 : vector<8x128xf32>
    %49 = vector.extract_strided_slice %10 {offsets = [1, 0, 0], sizes = [1, 8, 128], strides = [1, 1, 1]} : vector<8x8x128xf32> to vector<1x8x128xf32>
    %50 = vector.shape_cast %49 : vector<1x8x128xf32> to vector<8x128xf32>
    %51 = arith.addf %48, %50 : vector<8x128xf32>
    %52 = arith.addf %51, %46 : vector<8x128xf32>
    %cst_29 = arith.constant 1.000000e+00 : f32
    %53 = vector.broadcast %cst_29 : f32 to vector<8x128xf32>
    %54 = arith.cmpf oge, %52, %53 : vector<8x128xf32>
    %55 = arith.extui %54 : vector<8x128xi1> to vector<8x128xi32>
    %56 = arith.sitofp %55 : vector<8x128xi32> to vector<8x128xf32>
    %cst_30 = arith.constant 1.000000e+00 : f32
    %57 = vector.broadcast %cst_30 : f32 to vector<8x128xf32>
    %58 = arith.subf %57, %56 : vector<8x128xf32>
    %59 = arith.mulf %52, %58 : vector<8x128xf32>
    %60 = arith.truncf %56 : vector<8x128xf32> to vector<8x128xbf16>
    %c1 = arith.constant 1 : index
    %c0_31 = arith.constant 0 : index
    %c0_32 = arith.constant 0 : index
    %61 = vector.load %arg5[%c1, %c0_31, %c0_32] : memref<8x8x128xbf16, #tpu.memory_space<vmem>>, vector<1x8x128xbf16>
    %62 = vector.shape_cast %61 : vector<1x8x128xbf16> to vector<8x128xbf16>
    %63 = vector.shape_cast %60 : vector<8x128xbf16> to vector<1x8x128xbf16>
    tpu.vector_store %arg5[%c1, %c0_31, %c0_32], %63 {strides = array<i32>} : memref<8x8x128xbf16, #tpu.memory_space<vmem>>, vector<1x8x128xbf16>,
    %c1_33 = arith.constant 1 : index
    %c0_34 = arith.constant 0 : index
    %c0_35 = arith.constant 0 : index
    %64 = vector.load %arg6[%c1_33, %c0_34, %c0_35] : memref<8x8x128xf32, #tpu.memory_space<vmem>>, vector<1x8x128xf32>
    %65 = vector.shape_cast %64 : vector<1x8x128xf32> to vector<8x128xf32>
    %66 = vector.shape_cast %59 : vector<8x128xf32> to vector<1x8x128xf32>
    tpu.vector_store %arg6[%c1_33, %c0_34, %c0_35], %66 {strides = array<i32>} : memref<8x8x128xf32, #tpu.memory_space<vmem>>, vector<1x8x128xf32>,
    %c0_36 = arith.constant 0 : index
    %c0_37 = arith.constant 0 : index
    %67 = vector.load %arg7[%c0_36, %c0_37] : memref<8x128xf32, #tpu.memory_space<vmem>>, vector<8x128xf32>
    %c1_i32 = arith.constant 1 : i32
    %68 = arith.addi %13, %c1_i32 : i32
    %c20_i32_38 = arith.constant 20 : i32
    %69 = arith.cmpi slt, %68, %c20_i32_38 : i32
    %70 = arith.extui %69 : i1 to i32
    %71 = arith.sitofp %70 : i32 to f32
    %72 = vector.broadcast %71 : f32 to vector<8x128xf32>
    %73 = arith.mulf %56, %72 : vector<8x128xf32>
    %74 = arith.addf %67, %73 : vector<8x128xf32>
    %c0_39 = arith.constant 0 : index
    %c0_40 = arith.constant 0 : index
    %75 = vector.load %arg7[%c0_39, %c0_40] : memref<8x128xf32, #tpu.memory_space<vmem>>, vector<8x128xf32>
    tpu.vector_store %arg7[%c0_39, %c0_40], %74 {strides = array<i32>} : memref<8x128xf32, #tpu.memory_space<vmem>>, vector<8x128xf32>,
    %c0_41 = arith.constant 0 : index
    %c0_42 = arith.constant 0 : index
    %76 = vector.load %arg4[%c0_41, %c0_42] : memref<128x128xf32, #tpu.memory_space<vmem>>, vector<128x128xf32>
    %cst_43 = arith.constant dense<0.000000e+00> : vector<8x128xf32>
    %77 = tpu.matmul %56, %76, %cst_43 {dimension_numbers = #tpu.dot_dimension_numbers<[1], [0], [0], [1], [0, 0, 1, 1], [], []>} : vector<8x128xf32>, vector<128x128xf32>, vector<8x128xf32> -> vector<8x128xf32>
    %cst_44 = arith.constant 0.899999976 : f32
    %78 = vector.broadcast %cst_44 : f32 to vector<8x128xf32>
    %79 = arith.mulf %78, %59 : vector<8x128xf32>
    %80 = vector.extract_strided_slice %10 {offsets = [2, 0, 0], sizes = [1, 8, 128], strides = [1, 1, 1]} : vector<8x8x128xf32> to vector<1x8x128xf32>
    %81 = vector.shape_cast %80 : vector<1x8x128xf32> to vector<8x128xf32>
    %82 = arith.addf %79, %81 : vector<8x128xf32>
    %83 = arith.addf %82, %77 : vector<8x128xf32>
    %cst_45 = arith.constant 1.000000e+00 : f32
    %84 = vector.broadcast %cst_45 : f32 to vector<8x128xf32>
    %85 = arith.cmpf oge, %83, %84 : vector<8x128xf32>
    %86 = arith.extui %85 : vector<8x128xi1> to vector<8x128xi32>
    %87 = arith.sitofp %86 : vector<8x128xi32> to vector<8x128xf32>
    %cst_46 = arith.constant 1.000000e+00 : f32
    %88 = vector.broadcast %cst_46 : f32 to vector<8x128xf32>
    %89 = arith.subf %88, %87 : vector<8x128xf32>
    %90 = arith.mulf %83, %89 : vector<8x128xf32>
    %91 = arith.truncf %87 : vector<8x128xf32> to vector<8x128xbf16>
    %c2 = arith.constant 2 : index
    %c0_47 = arith.constant 0 : index
    %c0_48 = arith.constant 0 : index
    %92 = vector.load %arg5[%c2, %c0_47, %c0_48] : memref<8x8x128xbf16, #tpu.memory_space<vmem>>, vector<1x8x128xbf16>
    %93 = vector.shape_cast %92 : vector<1x8x128xbf16> to vector<8x128xbf16>
    %94 = vector.shape_cast %91 : vector<8x128xbf16> to vector<1x8x128xbf16>
    tpu.vector_store %arg5[%c2, %c0_47, %c0_48], %94 {strides = array<i32>} : memref<8x8x128xbf16, #tpu.memory_space<vmem>>, vector<1x8x128xbf16>,
    %c2_49 = arith.constant 2 : index
    %c0_50 = arith.constant 0 : index
    %c0_51 = arith.constant 0 : index
    %95 = vector.load %arg6[%c2_49, %c0_50, %c0_51] : memref<8x8x128xf32, #tpu.memory_space<vmem>>, vector<1x8x128xf32>
    %96 = vector.shape_cast %95 : vector<1x8x128xf32> to vector<8x128xf32>
    %97 = vector.shape_cast %90 : vector<8x128xf32> to vector<1x8x128xf32>
    tpu.vector_store %arg6[%c2_49, %c0_50, %c0_51], %97 {strides = array<i32>} : memref<8x8x128xf32, #tpu.memory_space<vmem>>, vector<1x8x128xf32>,
    %c0_52 = arith.constant 0 : index
    %c0_53 = arith.constant 0 : index
    %98 = vector.load %arg7[%c0_52, %c0_53] : memref<8x128xf32, #tpu.memory_space<vmem>>, vector<8x128xf32>
    %c2_i32 = arith.constant 2 : i32
    %99 = arith.addi %13, %c2_i32 : i32
    %c20_i32_54 = arith.constant 20 : i32
    %100 = arith.cmpi slt, %99, %c20_i32_54 : i32
    %101 = arith.extui %100 : i1 to i32
    %102 = arith.sitofp %101 : i32 to f32
    %103 = vector.broadcast %102 : f32 to vector<8x128xf32>
    %104 = arith.mulf %87, %103 : vector<8x128xf32>
    %105 = arith.addf %98, %104 : vector<8x128xf32>
    %c0_55 = arith.constant 0 : index
    %c0_56 = arith.constant 0 : index
    %106 = vector.load %arg7[%c0_55, %c0_56] : memref<8x128xf32, #tpu.memory_space<vmem>>, vector<8x128xf32>
    tpu.vector_store %arg7[%c0_55, %c0_56], %105 {strides = array<i32>} : memref<8x128xf32, #tpu.memory_space<vmem>>, vector<8x128xf32>,
    %c0_57 = arith.constant 0 : index
    %c0_58 = arith.constant 0 : index
    %107 = vector.load %arg4[%c0_57, %c0_58] : memref<128x128xf32, #tpu.memory_space<vmem>>, vector<128x128xf32>
    %cst_59 = arith.constant dense<0.000000e+00> : vector<8x128xf32>
    %108 = tpu.matmul %87, %107, %cst_59 {dimension_numbers = #tpu.dot_dimension_numbers<[1], [0], [0], [1], [0, 0, 1, 1], [], []>} : vector<8x128xf32>, vector<128x128xf32>, vector<8x128xf32> -> vector<8x128xf32>
    %cst_60 = arith.constant 0.899999976 : f32
    %109 = vector.broadcast %cst_60 : f32 to vector<8x128xf32>
    %110 = arith.mulf %109, %90 : vector<8x128xf32>
    %111 = vector.extract_strided_slice %10 {offsets = [3, 0, 0], sizes = [1, 8, 128], strides = [1, 1, 1]} : vector<8x8x128xf32> to vector<1x8x128xf32>
    %112 = vector.shape_cast %111 : vector<1x8x128xf32> to vector<8x128xf32>
    %113 = arith.addf %110, %112 : vector<8x128xf32>
    %114 = arith.addf %113, %108 : vector<8x128xf32>
    %cst_61 = arith.constant 1.000000e+00 : f32
    %115 = vector.broadcast %cst_61 : f32 to vector<8x128xf32>
    %116 = arith.cmpf oge, %114, %115 : vector<8x128xf32>
    %117 = arith.extui %116 : vector<8x128xi1> to vector<8x128xi32>
    %118 = arith.sitofp %117 : vector<8x128xi32> to vector<8x128xf32>
    %cst_62 = arith.constant 1.000000e+00 : f32
    %119 = vector.broadcast %cst_62 : f32 to vector<8x128xf32>
    %120 = arith.subf %119, %118 : vector<8x128xf32>
    %121 = arith.mulf %114, %120 : vector<8x128xf32>
    %122 = arith.truncf %118 : vector<8x128xf32> to vector<8x128xbf16>
    %c3 = arith.constant 3 : index
    %c0_63 = arith.constant 0 : index
    %c0_64 = arith.constant 0 : index
    %123 = vector.load %arg5[%c3, %c0_63, %c0_64] : memref<8x8x128xbf16, #tpu.memory_space<vmem>>, vector<1x8x128xbf16>
    %124 = vector.shape_cast %123 : vector<1x8x128xbf16> to vector<8x128xbf16>
    %125 = vector.shape_cast %122 : vector<8x128xbf16> to vector<1x8x128xbf16>
    tpu.vector_store %arg5[%c3, %c0_63, %c0_64], %125 {strides = array<i32>} : memref<8x8x128xbf16, #tpu.memory_space<vmem>>, vector<1x8x128xbf16>,
    %c3_65 = arith.constant 3 : index
    %c0_66 = arith.constant 0 : index
    %c0_67 = arith.constant 0 : index
    %126 = vector.load %arg6[%c3_65, %c0_66, %c0_67] : memref<8x8x128xf32, #tpu.memory_space<vmem>>, vector<1x8x128xf32>
    %127 = vector.shape_cast %126 : vector<1x8x128xf32> to vector<8x128xf32>
    %128 = vector.shape_cast %121 : vector<8x128xf32> to vector<1x8x128xf32>
    tpu.vector_store %arg6[%c3_65, %c0_66, %c0_67], %128 {strides = array<i32>} : memref<8x8x128xf32, #tpu.memory_space<vmem>>, vector<1x8x128xf32>,
    %c0_68 = arith.constant 0 : index
    %c0_69 = arith.constant 0 : index
    %129 = vector.load %arg7[%c0_68, %c0_69] : memref<8x128xf32, #tpu.memory_space<vmem>>, vector<8x128xf32>
    %c3_i32 = arith.constant 3 : i32
    %130 = arith.addi %13, %c3_i32 : i32
    %c20_i32_70 = arith.constant 20 : i32
    %131 = arith.cmpi slt, %130, %c20_i32_70 : i32
    %132 = arith.extui %131 : i1 to i32
    %133 = arith.sitofp %132 : i32 to f32
    %134 = vector.broadcast %133 : f32 to vector<8x128xf32>
    %135 = arith.mulf %118, %134 : vector<8x128xf32>
    %136 = arith.addf %129, %135 : vector<8x128xf32>
    %c0_71 = arith.constant 0 : index
    %c0_72 = arith.constant 0 : index
    %137 = vector.load %arg7[%c0_71, %c0_72] : memref<8x128xf32, #tpu.memory_space<vmem>>, vector<8x128xf32>
    tpu.vector_store %arg7[%c0_71, %c0_72], %136 {strides = array<i32>} : memref<8x128xf32, #tpu.memory_space<vmem>>, vector<8x128xf32>,
    %c0_73 = arith.constant 0 : index
    %c0_74 = arith.constant 0 : index
    %138 = vector.load %arg4[%c0_73, %c0_74] : memref<128x128xf32, #tpu.memory_space<vmem>>, vector<128x128xf32>
    %cst_75 = arith.constant dense<0.000000e+00> : vector<8x128xf32>
    %139 = tpu.matmul %118, %138, %cst_75 {dimension_numbers = #tpu.dot_dimension_numbers<[1], [0], [0], [1], [0, 0, 1, 1], [], []>} : vector<8x128xf32>, vector<128x128xf32>, vector<8x128xf32> -> vector<8x128xf32>
    %cst_76 = arith.constant 0.899999976 : f32
    %140 = vector.broadcast %cst_76 : f32 to vector<8x128xf32>
    %141 = arith.mulf %140, %121 : vector<8x128xf32>
    %142 = vector.extract_strided_slice %10 {offsets = [4, 0, 0], sizes = [1, 8, 128], strides = [1, 1, 1]} : vector<8x8x128xf32> to vector<1x8x128xf32>
    %143 = vector.shape_cast %142 : vector<1x8x128xf32> to vector<8x128xf32>
    %144 = arith.addf %141, %143 : vector<8x128xf32>
    %145 = arith.addf %144, %139 : vector<8x128xf32>
    %cst_77 = arith.constant 1.000000e+00 : f32
    %146 = vector.broadcast %cst_77 : f32 to vector<8x128xf32>
    %147 = arith.cmpf oge, %145, %146 : vector<8x128xf32>
    %148 = arith.extui %147 : vector<8x128xi1> to vector<8x128xi32>
    %149 = arith.sitofp %148 : vector<8x128xi32> to vector<8x128xf32>
    %cst_78 = arith.constant 1.000000e+00 : f32
    %150 = vector.broadcast %cst_78 : f32 to vector<8x128xf32>
    %151 = arith.subf %150, %149 : vector<8x128xf32>
    %152 = arith.mulf %145, %151 : vector<8x128xf32>
    %153 = arith.truncf %149 : vector<8x128xf32> to vector<8x128xbf16>
    %c4 = arith.constant 4 : index
    %c0_79 = arith.constant 0 : index
    %c0_80 = arith.constant 0 : index
    %154 = vector.load %arg5[%c4, %c0_79, %c0_80] : memref<8x8x128xbf16, #tpu.memory_space<vmem>>, vector<1x8x128xbf16>
    %155 = vector.shape_cast %154 : vector<1x8x128xbf16> to vector<8x128xbf16>
    %156 = vector.shape_cast %153 : vector<8x128xbf16> to vector<1x8x128xbf16>
    tpu.vector_store %arg5[%c4, %c0_79, %c0_80], %156 {strides = array<i32>} : memref<8x8x128xbf16, #tpu.memory_space<vmem>>, vector<1x8x128xbf16>,
    %c4_81 = arith.constant 4 : index
    %c0_82 = arith.constant 0 : index
    %c0_83 = arith.constant 0 : index
    %157 = vector.load %arg6[%c4_81, %c0_82, %c0_83] : memref<8x8x128xf32, #tpu.memory_space<vmem>>, vector<1x8x128xf32>
    %158 = vector.shape_cast %157 : vector<1x8x128xf32> to vector<8x128xf32>
    %159 = vector.shape_cast %152 : vector<8x128xf32> to vector<1x8x128xf32>
    tpu.vector_store %arg6[%c4_81, %c0_82, %c0_83], %159 {strides = array<i32>} : memref<8x8x128xf32, #tpu.memory_space<vmem>>, vector<1x8x128xf32>,
    %c0_84 = arith.constant 0 : index
    %c0_85 = arith.constant 0 : index
    %160 = vector.load %arg7[%c0_84, %c0_85] : memref<8x128xf32, #tpu.memory_space<vmem>>, vector<8x128xf32>
    %c4_i32 = arith.constant 4 : i32
    %161 = arith.addi %13, %c4_i32 : i32
    %c20_i32_86 = arith.constant 20 : i32
    %162 = arith.cmpi slt, %161, %c20_i32_86 : i32
    %163 = arith.extui %162 : i1 to i32
    %164 = arith.sitofp %163 : i32 to f32
    %165 = vector.broadcast %164 : f32 to vector<8x128xf32>
    %166 = arith.mulf %149, %165 : vector<8x128xf32>
    %167 = arith.addf %160, %166 : vector<8x128xf32>
    %c0_87 = arith.constant 0 : index
    %c0_88 = arith.constant 0 : index
    %168 = vector.load %arg7[%c0_87, %c0_88] : memref<8x128xf32, #tpu.memory_space<vmem>>, vector<8x128xf32>
    tpu.vector_store %arg7[%c0_87, %c0_88], %167 {strides = array<i32>} : memref<8x128xf32, #tpu.memory_space<vmem>>, vector<8x128xf32>,
    %c0_89 = arith.constant 0 : index
    %c0_90 = arith.constant 0 : index
    %169 = vector.load %arg4[%c0_89, %c0_90] : memref<128x128xf32, #tpu.memory_space<vmem>>, vector<128x128xf32>
    %cst_91 = arith.constant dense<0.000000e+00> : vector<8x128xf32>
    %170 = tpu.matmul %149, %169, %cst_91 {dimension_numbers = #tpu.dot_dimension_numbers<[1], [0], [0], [1], [0, 0, 1, 1], [], []>} : vector<8x128xf32>, vector<128x128xf32>, vector<8x128xf32> -> vector<8x128xf32>
    %cst_92 = arith.constant 0.899999976 : f32
    %171 = vector.broadcast %cst_92 : f32 to vector<8x128xf32>
    %172 = arith.mulf %171, %152 : vector<8x128xf32>
    %173 = vector.extract_strided_slice %10 {offsets = [5, 0, 0], sizes = [1, 8, 128], strides = [1, 1, 1]} : vector<8x8x128xf32> to vector<1x8x128xf32>
    %174 = vector.shape_cast %173 : vector<1x8x128xf32> to vector<8x128xf32>
    %175 = arith.addf %172, %174 : vector<8x128xf32>
    %176 = arith.addf %175, %170 : vector<8x128xf32>
    %cst_93 = arith.constant 1.000000e+00 : f32
    %177 = vector.broadcast %cst_93 : f32 to vector<8x128xf32>
    %178 = arith.cmpf oge, %176, %177 : vector<8x128xf32>
    %179 = arith.extui %178 : vector<8x128xi1> to vector<8x128xi32>
    %180 = arith.sitofp %179 : vector<8x128xi32> to vector<8x128xf32>
    %cst_94 = arith.constant 1.000000e+00 : f32
    %181 = vector.broadcast %cst_94 : f32 to vector<8x128xf32>
    %182 = arith.subf %181, %180 : vector<8x128xf32>
    %183 = arith.mulf %176, %182 : vector<8x128xf32>
    %184 = arith.truncf %180 : vector<8x128xf32> to vector<8x128xbf16>
    %c5 = arith.constant 5 : index
    %c0_95 = arith.constant 0 : index
    %c0_96 = arith.constant 0 : index
    %185 = vector.load %arg5[%c5, %c0_95, %c0_96] : memref<8x8x128xbf16, #tpu.memory_space<vmem>>, vector<1x8x128xbf16>
    %186 = vector.shape_cast %185 : vector<1x8x128xbf16> to vector<8x128xbf16>
    %187 = vector.shape_cast %184 : vector<8x128xbf16> to vector<1x8x128xbf16>
    tpu.vector_store %arg5[%c5, %c0_95, %c0_96], %187 {strides = array<i32>} : memref<8x8x128xbf16, #tpu.memory_space<vmem>>, vector<1x8x128xbf16>,
    %c5_97 = arith.constant 5 : index
    %c0_98 = arith.constant 0 : index
    %c0_99 = arith.constant 0 : index
    %188 = vector.load %arg6[%c5_97, %c0_98, %c0_99] : memref<8x8x128xf32, #tpu.memory_space<vmem>>, vector<1x8x128xf32>
    %189 = vector.shape_cast %188 : vector<1x8x128xf32> to vector<8x128xf32>
    %190 = vector.shape_cast %183 : vector<8x128xf32> to vector<1x8x128xf32>
    tpu.vector_store %arg6[%c5_97, %c0_98, %c0_99], %190 {strides = array<i32>} : memref<8x8x128xf32, #tpu.memory_space<vmem>>, vector<1x8x128xf32>,
    %c0_100 = arith.constant 0 : index
    %c0_101 = arith.constant 0 : index
    %191 = vector.load %arg7[%c0_100, %c0_101] : memref<8x128xf32, #tpu.memory_space<vmem>>, vector<8x128xf32>
    %c5_i32 = arith.constant 5 : i32
    %192 = arith.addi %13, %c5_i32 : i32
    %c20_i32_102 = arith.constant 20 : i32
    %193 = arith.cmpi slt, %192, %c20_i32_102 : i32
    %194 = arith.extui %193 : i1 to i32
    %195 = arith.sitofp %194 : i32 to f32
    %196 = vector.broadcast %195 : f32 to vector<8x128xf32>
    %197 = arith.mulf %180, %196 : vector<8x128xf32>
    %198 = arith.addf %191, %197 : vector<8x128xf32>
    %c0_103 = arith.constant 0 : index
    %c0_104 = arith.constant 0 : index
    %199 = vector.load %arg7[%c0_103, %c0_104] : memref<8x128xf32, #tpu.memory_space<vmem>>, vector<8x128xf32>
    tpu.vector_store %arg7[%c0_103, %c0_104], %198 {strides = array<i32>} : memref<8x128xf32, #tpu.memory_space<vmem>>, vector<8x128xf32>,
    %c0_105 = arith.constant 0 : index
    %c0_106 = arith.constant 0 : index
    %200 = vector.load %arg4[%c0_105, %c0_106] : memref<128x128xf32, #tpu.memory_space<vmem>>, vector<128x128xf32>
    %cst_107 = arith.constant dense<0.000000e+00> : vector<8x128xf32>
    %201 = tpu.matmul %180, %200, %cst_107 {dimension_numbers = #tpu.dot_dimension_numbers<[1], [0], [0], [1], [0, 0, 1, 1], [], []>} : vector<8x128xf32>, vector<128x128xf32>, vector<8x128xf32> -> vector<8x128xf32>
    %cst_108 = arith.constant 0.899999976 : f32
    %202 = vector.broadcast %cst_108 : f32 to vector<8x128xf32>
    %203 = arith.mulf %202, %183 : vector<8x128xf32>
    %204 = vector.extract_strided_slice %10 {offsets = [6, 0, 0], sizes = [1, 8, 128], strides = [1, 1, 1]} : vector<8x8x128xf32> to vector<1x8x128xf32>
    %205 = vector.shape_cast %204 : vector<1x8x128xf32> to vector<8x128xf32>
    %206 = arith.addf %203, %205 : vector<8x128xf32>
    %207 = arith.addf %206, %201 : vector<8x128xf32>
    %cst_109 = arith.constant 1.000000e+00 : f32
    %208 = vector.broadcast %cst_109 : f32 to vector<8x128xf32>
    %209 = arith.cmpf oge, %207, %208 : vector<8x128xf32>
    %210 = arith.extui %209 : vector<8x128xi1> to vector<8x128xi32>
    %211 = arith.sitofp %210 : vector<8x128xi32> to vector<8x128xf32>
    %cst_110 = arith.constant 1.000000e+00 : f32
    %212 = vector.broadcast %cst_110 : f32 to vector<8x128xf32>
    %213 = arith.subf %212, %211 : vector<8x128xf32>
    %214 = arith.mulf %207, %213 : vector<8x128xf32>
    %215 = arith.truncf %211 : vector<8x128xf32> to vector<8x128xbf16>
    %c6 = arith.constant 6 : index
    %c0_111 = arith.constant 0 : index
    %c0_112 = arith.constant 0 : index
    %216 = vector.load %arg5[%c6, %c0_111, %c0_112] : memref<8x8x128xbf16, #tpu.memory_space<vmem>>, vector<1x8x128xbf16>
    %217 = vector.shape_cast %216 : vector<1x8x128xbf16> to vector<8x128xbf16>
    %218 = vector.shape_cast %215 : vector<8x128xbf16> to vector<1x8x128xbf16>
    tpu.vector_store %arg5[%c6, %c0_111, %c0_112], %218 {strides = array<i32>} : memref<8x8x128xbf16, #tpu.memory_space<vmem>>, vector<1x8x128xbf16>,
    %c6_113 = arith.constant 6 : index
    %c0_114 = arith.constant 0 : index
    %c0_115 = arith.constant 0 : index
    %219 = vector.load %arg6[%c6_113, %c0_114, %c0_115] : memref<8x8x128xf32, #tpu.memory_space<vmem>>, vector<1x8x128xf32>
    %220 = vector.shape_cast %219 : vector<1x8x128xf32> to vector<8x128xf32>
    %221 = vector.shape_cast %214 : vector<8x128xf32> to vector<1x8x128xf32>
    tpu.vector_store %arg6[%c6_113, %c0_114, %c0_115], %221 {strides = array<i32>} : memref<8x8x128xf32, #tpu.memory_space<vmem>>, vector<1x8x128xf32>,
    %c0_116 = arith.constant 0 : index
    %c0_117 = arith.constant 0 : index
    %222 = vector.load %arg7[%c0_116, %c0_117] : memref<8x128xf32, #tpu.memory_space<vmem>>, vector<8x128xf32>
    %c6_i32 = arith.constant 6 : i32
    %223 = arith.addi %13, %c6_i32 : i32
    %c20_i32_118 = arith.constant 20 : i32
    %224 = arith.cmpi slt, %223, %c20_i32_118 : i32
    %225 = arith.extui %224 : i1 to i32
    %226 = arith.sitofp %225 : i32 to f32
    %227 = vector.broadcast %226 : f32 to vector<8x128xf32>
    %228 = arith.mulf %211, %227 : vector<8x128xf32>
    %229 = arith.addf %222, %228 : vector<8x128xf32>
    %c0_119 = arith.constant 0 : index
    %c0_120 = arith.constant 0 : index
    %230 = vector.load %arg7[%c0_119, %c0_120] : memref<8x128xf32, #tpu.memory_space<vmem>>, vector<8x128xf32>
    tpu.vector_store %arg7[%c0_119, %c0_120], %229 {strides = array<i32>} : memref<8x128xf32, #tpu.memory_space<vmem>>, vector<8x128xf32>,
    %c0_121 = arith.constant 0 : index
    %c0_122 = arith.constant 0 : index
    %231 = vector.load %arg4[%c0_121, %c0_122] : memref<128x128xf32, #tpu.memory_space<vmem>>, vector<128x128xf32>
    %cst_123 = arith.constant dense<0.000000e+00> : vector<8x128xf32>
    %232 = tpu.matmul %211, %231, %cst_123 {dimension_numbers = #tpu.dot_dimension_numbers<[1], [0], [0], [1], [0, 0, 1, 1], [], []>} : vector<8x128xf32>, vector<128x128xf32>, vector<8x128xf32> -> vector<8x128xf32>
    %cst_124 = arith.constant 0.899999976 : f32
    %233 = vector.broadcast %cst_124 : f32 to vector<8x128xf32>
    %234 = arith.mulf %233, %214 : vector<8x128xf32>
    %235 = vector.extract_strided_slice %10 {offsets = [7, 0, 0], sizes = [1, 8, 128], strides = [1, 1, 1]} : vector<8x8x128xf32> to vector<1x8x128xf32>
    %236 = vector.shape_cast %235 : vector<1x8x128xf32> to vector<8x128xf32>
    %237 = arith.addf %234, %236 : vector<8x128xf32>
    %238 = arith.addf %237, %232 : vector<8x128xf32>
    %cst_125 = arith.constant 1.000000e+00 : f32
    %239 = vector.broadcast %cst_125 : f32 to vector<8x128xf32>
    %240 = arith.cmpf oge, %238, %239 : vector<8x128xf32>
    %241 = arith.extui %240 : vector<8x128xi1> to vector<8x128xi32>
    %242 = arith.sitofp %241 : vector<8x128xi32> to vector<8x128xf32>
    %cst_126 = arith.constant 1.000000e+00 : f32
    %243 = vector.broadcast %cst_126 : f32 to vector<8x128xf32>
    %244 = arith.subf %243, %242 : vector<8x128xf32>
    %245 = arith.mulf %238, %244 : vector<8x128xf32>
    %246 = arith.truncf %242 : vector<8x128xf32> to vector<8x128xbf16>
    %c7 = arith.constant 7 : index
    %c0_127 = arith.constant 0 : index
    %c0_128 = arith.constant 0 : index
    %247 = vector.load %arg5[%c7, %c0_127, %c0_128] : memref<8x8x128xbf16, #tpu.memory_space<vmem>>, vector<1x8x128xbf16>
    %248 = vector.shape_cast %247 : vector<1x8x128xbf16> to vector<8x128xbf16>
    %249 = vector.shape_cast %246 : vector<8x128xbf16> to vector<1x8x128xbf16>
    tpu.vector_store %arg5[%c7, %c0_127, %c0_128], %249 {strides = array<i32>} : memref<8x8x128xbf16, #tpu.memory_space<vmem>>, vector<1x8x128xbf16>,
    %c7_129 = arith.constant 7 : index
    %c0_130 = arith.constant 0 : index
    %c0_131 = arith.constant 0 : index
    %250 = vector.load %arg6[%c7_129, %c0_130, %c0_131] : memref<8x8x128xf32, #tpu.memory_space<vmem>>, vector<1x8x128xf32>
    %251 = vector.shape_cast %250 : vector<1x8x128xf32> to vector<8x128xf32>
    %252 = vector.shape_cast %245 : vector<8x128xf32> to vector<1x8x128xf32>
    tpu.vector_store %arg6[%c7_129, %c0_130, %c0_131], %252 {strides = array<i32>} : memref<8x8x128xf32, #tpu.memory_space<vmem>>, vector<1x8x128xf32>,
    %c0_132 = arith.constant 0 : index
    %c0_133 = arith.constant 0 : index
    %253 = vector.load %arg7[%c0_132, %c0_133] : memref<8x128xf32, #tpu.memory_space<vmem>>, vector<8x128xf32>
    %c7_i32 = arith.constant 7 : i32
    %254 = arith.addi %13, %c7_i32 : i32
    %c20_i32_134 = arith.constant 20 : i32
    %255 = arith.cmpi slt, %254, %c20_i32_134 : i32
    %256 = arith.extui %255 : i1 to i32
    %257 = arith.sitofp %256 : i32 to f32
    %258 = vector.broadcast %257 : f32 to vector<8x128xf32>
    %259 = arith.mulf %242, %258 : vector<8x128xf32>
    %260 = arith.addf %253, %259 : vector<8x128xf32>
    %c0_135 = arith.constant 0 : index
    %c0_136 = arith.constant 0 : index
    %261 = vector.load %arg7[%c0_135, %c0_136] : memref<8x128xf32, #tpu.memory_space<vmem>>, vector<8x128xf32>
    tpu.vector_store %arg7[%c0_135, %c0_136], %260 {strides = array<i32>} : memref<8x128xf32, #tpu.memory_space<vmem>>, vector<8x128xf32>,
    %c0_137 = arith.constant 0 : index
    %c0_138 = arith.constant 0 : index
    %262 = vector.load %arg8[%c0_137, %c0_138] : memref<8x128xf32, #tpu.memory_space<vmem>>, vector<8x128xf32>
    tpu.vector_store %arg8[%c0_137, %c0_138], %245 {strides = array<i32>} : memref<8x128xf32, #tpu.memory_space<vmem>>, vector<8x128xf32>,
    %c0_139 = arith.constant 0 : index
    %c0_140 = arith.constant 0 : index
    %263 = vector.load %arg9[%c0_139, %c0_140] : memref<8x128xf32, #tpu.memory_space<vmem>>, vector<8x128xf32>
    tpu.vector_store %arg9[%c0_139, %c0_140], %242 {strides = array<i32>} : memref<8x128xf32, #tpu.memory_space<vmem>>, vector<8x128xf32>,
    return
  }
  func.func @transform_0(%arg0: i32, %arg1: i32) -> (i32, i32, i32) {
    %c0_i32 = arith.constant 0 : i32
    %c0_i32_0 = arith.constant 0 : i32
    return %arg0, %arg1, %c0_i32 : i32, i32, i32
  }
  func.func @transform_1(%arg0: i32, %arg1: i32) -> (i32, i32) {
    %c0_i32 = arith.constant 0 : i32
    %c0_i32_0 = arith.constant 0 : i32
    %c0_i32_1 = arith.constant 0 : i32
    return %c0_i32, %c0_i32_0 : i32, i32
  }
  func.func @transform_2(%arg0: i32, %arg1: i32) -> (i32, i32) {
    %c0_i32 = arith.constant 0 : i32
    %c0_i32_0 = arith.constant 0 : i32
    %c0_i32_1 = arith.constant 0 : i32
    return %c0_i32, %c0_i32_0 : i32, i32
  }
  func.func @transform_3(%arg0: i32, %arg1: i32) -> (i32, i32, i32) {
    %c0_i32 = arith.constant 0 : i32
    %c0_i32_0 = arith.constant 0 : i32
    return %arg1, %arg0, %c0_i32 : i32, i32, i32
  }
  func.func @transform_4(%arg0: i32, %arg1: i32) -> (i32, i32, i32) {
    %c0_i32 = arith.constant 0 : i32
    %c0_i32_0 = arith.constant 0 : i32
    return %arg1, %arg0, %c0_i32 : i32, i32, i32
  }
  func.func @transform_5(%arg0: i32, %arg1: i32) -> (i32, i32) {
    %c0_i32 = arith.constant 0 : i32
    %c0_i32_0 = arith.constant 0 : i32
    return %arg0, %c0_i32 : i32, i32
  }
}

</mosaic_0001>

<bundles_post_ra>
// kernel: tpu_custom_call.1
= control target key start
LH: loop header
LB: loop body
LE: loop exit
PB: predicated region body
PF: predicated region fallthrough
CT: control target
= control target key end

     0   :  { %s2749_s0 = inlined_call_operand.vmem [shape: f32[1,24,8], index: 0, kind: input, shape index: {}]   ;;  %s2750_s1 = inlined_call_operand.vmem [shape: f32[1,128], index: 1, kind: input, shape index: {}]   ;;  %s2751_s2 = inlined_call_operand.hbm [shape: f32[128,128], index: 2, kind: input, shape index: {}]   ;;  %s2752_s3 = inlined_call_operand.hbm [shape: bf16[24,8,128], index: 3, kind: output, shape index: {0}]   ;;  %s2753_s4 = inlined_call_operand.hbm [shape: f32[24,8,128], index: 4, kind: output, shape index: {1}]   ;;  %s2754_s5 = inlined_call_operand.hbm [shape: f32[8,128], index: 5, kind: output, shape index: {2}]  }
   0x1   :  { %2757 = sst [smem:[#allocation15_spill]] %s2749_s0 }
   0x2   :  { %11 = vsyncpa [#allocation5], 0 }
   0x3   :  { %12 = vsyncpa [#allocation6], 0 }
   0x4   :  { %14 = vsyncpa [#allocation6 + $0x1], 0 }
   0x5   :  { %15 = vsyncpa [#allocation9], 0 }
   0x6   :  { %17 = vsyncpa [#allocation9 + $0x1], 0  ;;  %s2179_s18 = smov 0   ;;  %s2181_s19 = smov 0  }
   0x7   :  { %s2183_s20 = smov 0   ;;  %s2185_s21 = smov 0  }
   0x8   :  { %s2187_s22 = smov 0   ;;  %s2189_s23 = smov 0  }
   0x9 LB: > { %s2210_s24 = sadd.s32 4294967295, %s2133_s23   ;;  %s2756_s25 = sadd.s32 4294967294, %s2133_s23   ;;  %s2133_s23 = sphi %s2189_s23, %s23_s23   ;;  %s2129_s22 = sphi %s2187_s22, %s2773_s22   ;;  %s2125_s21 = sphi %s2185_s21, %s2772_s21   ;;  %s2121_s20 = sphi %s2183_s20, %s2771_s20   ;;  %s2117_s19 = sphi %s2181_s19, %s2770_s19   ;;  %s2113_s18 = sphi %s2179_s18, %s2769_s18  }
   0xa   : > { %s32_s26 = sadd.s32 1, %s2129_s22  ;;  %s114_s27 = sadd.s32 1, %s2121_s20 }
   0xb   : > { %p33_p0 = scmp.ge.s32.totalorder %s32_s26, 3  ;;  %p124_p1 = scmp.ne.s32.totalorder %s2121_s20, %s2117_s19 }
   0xc   : > { %p2755_p2 = scmp.eq.s32.totalorder %s2210_s24, 2  ;;  %p130_p3 = scmp.ne.s32.totalorder %s2117_s19, %s2113_s18 }
   0xd   : > { %s2775_s26 = smov (%p33_p0, %s32_s26), 0  ;;  %p131_p5 = scmp.eq.s32.totalorder %s2756_s25, 2 }
   0xe   : > { %p2224_p4 = por %p2755_p2, %p124_p1  ;;  %s109_s29 = ssub.s32 %s2129_s22, %s2775_s26 }
   0xf   : > { %p1413_p6 = scmp.ge.s32.totalorder %s2133_s23, 1  ;;  %p112_p7 = scmp.eq.s32.totalorder %s109_s29, 0 }
  0x10   : > { %p2233_p8 = por %p131_p5, %p130_p3  ;;  %p192_p9 = scmp.lt.s32.totalorder %s2133_s23, 4 }
  0x11   : > { %s2239_s6 = scalar_select %p112_p7, %s2121_s20, %s114_s27  }
  0x12   : > { %p2241_p10 = pnand %p1413_p6, %p192_p9  ;;  %p1904_p11 = scmp.eq.s32.totalorder %s2210_s24, 0 }
  0x13   : > { %s2135_s8 = smov [#allocation4]  }
  0x14   : > { %p1893_p12 = pneg %p2241_p10  ;;  %s207_s9 = sshll.u32 %s2135_s8, 4  ;;  %s208_s9 = int_to_ptr.vmem [resolvable:$true] %s207_s9 }
  0x15   : > { %s1980_s10 = scalar_lea.vmem %s208_s9, 2048  ;;  %p1988_p7 = scmp.lt.s32.totalorder %s208_s9, %s208_s9 }
  0x16   : > { %p1894_p13 = pnand %p1904_p11, %p1893_p12  ;;  %p1981_p1 = scmp.ne.s32.totalorder %s208_s9, %s1980_s10 }
  0x17   : > { %p1989_p2 = scmp.lt.s32.totalorder %s1980_s10, %s1980_s10 }
  0x18   : > { %p1971_p0 = pneg %p1894_p13 }
  0x19   : > { %p1990_p6 = por %p1989_p2, %p1988_p7 }
  0x1a   : > { %p1983_p3 = pnand %p1981_p1, %p1971_p0 }
  0x1c   : > { %p1984_p5 = pneg %p1983_p3 }
  0x1e   : > { %p1991_p9 = pnand %p1990_p6, %p1984_p5 }
  0x20   : > { %1994 = shalt.err (!%p1991_p9)
}
  0x21   : > { %s2136_s11 = smov 128   ;;  %s2137_s12 = smov 8  }
  0x22   : > { %1896 = dma.hbm_to_vmem [thread:$0]  (!%p1894_p13), %s2751_s2, 2048, %s208_s9, [#allocation5], %s2136_s11, %s2136_s11, %s2137_s12  }
  0x23   : > { %234 = sbr.rel (%p2241_p10) target bundleno = 1716 (0x6b4), region = 32 }
  0x28   : > { %2096 = dma.done.wait (%p1904_p11), [#allocation5], 2048  }
  0x29   : > { %2098 = vsyncadd (%p1904_p11), [#allocation5], 4294965248  ;;  %s2260_s15 = sand.u32 1, %s2117_s19   ;;  %p272_p2 = scmp.lt.s32.totalorder %s2125_s21, 2 }
  0x2a   : > { %s1418_s16 = sshll.u32 %s2260_s15, 5  ;;  %s1419_s17 = sshll.u32 %s2260_s15, 6 }
  0x2b   : > { %s273_s27 = scalar_select %p272_p2, %s2125_s21, 2 }
  0x2c   : > { %s2761_s0 = sld [smem:[#allocation15_spill]]  ;;  %s2269_s10 = scalar_lea.vmem [#allocation7], %s1418_s16 }
  0x2d   : > { %s1420_s29 = sshll.u32 %s273_s27, 3  ;;  %s2271_s11 = scalar_lea.vmem [#allocation8], %s1419_s17 }
  0x2e   : > { %p1421_p10 = scmp.ne.s32.totalorder %s2125_s21, 0 }
  0x30   : > { %283 = sbr.rel (%p1421_p10) target bundleno = 56 (0x38), region = 40 }
  0x32   : > { %s277_s9 = scalar_lea.vmem %s2761_s0, %s1420_s29 }
  0x35   : > { %v2138_v0 = vmov 0.0  }
  0x36   : > { %284 = vst [vmem:[#allocation2] sm:$0xff] %v2138_v0  ;;  %285 = vst [vmem:[#allocation3] sm:$0xff] %v2138_v0 }
  0x37   : > { %286 = vst [vmem:[#allocation10] sm:$0xff] %v2138_v0 }
  0x38 PF: > { %v2274_v1 = vld [vmem:[#allocation4 + $0x78] sm:$0xff]  ;;  %v288_v2 = vlaneseq  ;;  %v2139_v3 = vmov 0.0   ;;  %v2277_v4 = vld [vmem:[#allocation4 + $0x70] sm:$0xff]  ;;  %vm2140_vm0 = vmmov 0   ;;  %v2286_v6 = vld [vmem:[#allocation4 + $0x68] sm:$0xff]  ;;  %v2141_v38 = vmov 1.0  }
  0x39   : > { %1601 = vmatprep.subr.mxu0 %v2139_v3  ;;  %1633 = vmatprep.mubr.msk.f32.mxu0 %vm2140_vm0, %v2139_v3  ;;  %v2294_v9 = vld [vmem:[#allocation4 + $0x60] sm:$0xff]  ;;  %v2296_v10 = vld [vmem:[%s277_s9] sm:$0xff]  ;;  %v2303_v12 = vld [vmem:[#allocation4 + $0x58] sm:$0xff]  ;;  %s2467_s14 = sshll.u32 %s2125_s21, 3 }
  0x3a   : > { %1602 = vmatpush3.msra.mxu0 %v2274_v1  ;;  %v2282_v5 = vshrl.u32 %v288_v2, 7  ;;  %1636 = vmatprep.subr.mxu1 %v2139_v3  ;;  %v2309_v14 = vld [vmem:[#allocation4 + $0x50] sm:$0xff]  ;;  %v2315_v15 = vld [vmem:[#allocation4 + $0x48] sm:$0xff]  ;;  %v2320_v16 = vld [vmem:[#allocation4 + $0x40] sm:$0xff]  ;;  %p460_p11 = scmp.lt.s32.totalorder %s2467_s14, 20  ;;  %s567_s16 = sadd.s32 1, %s2467_s14 }
  0x3b   : > { %1603 = vmatprep.subr.mxu0 %v2139_v3  ;;  %1637 = vmatpush3.msra.mxu1 %v2274_v1  ;;  %v2326_v17 = vld [vmem:[#allocation4 + $0x38] sm:$0xff]  ;;  %v2332_v18 = vld [vmem:[#allocation4 + $0x30] sm:$0xff]  ;;  %v2338_v19 = vld [vmem:[#allocation4 + $0x28] sm:$0xff]  ;;  %p568_p12 = scmp.lt.s32.totalorder %s567_s16, 20  ;;  %s675_s8 = sadd.s32 2, %s2467_s14 }
  0x3c   : > { %1604 = vmatpush3.msra.mxu0 %v2277_v4  ;;  %v290_v7 = vsub.s32 0, %v2282_v5  ;;  %v297_v8 = vsub.s32 1, %v2282_v5  ;;  %1638 = vmatprep.subr.mxu1 %v2139_v3  ;;  %v2344_v20 = vld [vmem:[#allocation4 + $0x20] sm:$0xff]  ;;  %v2350_v21 = vld [vmem:[#allocation4 + $0x18] sm:$0xff]  ;;  %v2356_v22 = vld [vmem:[#allocation4 + $0x10] sm:$0xff]  ;;  %v304_v26 = vsub.s32 2, %v2282_v5 }
  0x3d   : > { %1605 = vmatprep.subr.mxu0 %v2139_v3  ;;  %1639 = vmatpush3.msra.mxu1 %v2277_v4  ;;  %v2362_v23 = vld [vmem:[#allocation4 + $0x8] sm:$0xff]  ;;  %v2368_v24 = vld [vmem:[#allocation4] sm:$0xff]  ;;  %v360_v25 = vld [vmem:[#allocation3] sm:$0xff]  ;;  %v311_v42 = vsub.s32 3, %v2282_v5  ;;  %s461_s17 = scalar_select %p460_p11, 1, 0 }
  0x3e   : > { %1606 = vmatpush3.msra.mxu0 %v2286_v6  ;;  %v291_v11 = vrot.slane %v2296_v10, %v290_v7  ;;  %1640 = vmatprep.subr.mxu1 %v2139_v3  ;;  %v298_v13 = vrot.slane %v2296_v10, %v297_v8  ;;  %v305_v27 = vrot.slane %v2296_v10, %v304_v26  ;;  %v2423_v28 = vld [vmem:[%s2750_s1] ss:$0 sm:$0xff]  ;;  %s569_s29 = scalar_select %p568_p12, 1, 0  ;;  %v459_v52 = vld [vmem:[#allocation10] sm:$0xff]  ;;  %v318_v62 = vsub.s32 4, %v2282_v5 }
  0x3f   : > { %1607 = vmatprep.subr.mxu0 %v2139_v3  ;;  %1641 = vmatpush3.msra.mxu1 %v2286_v6  ;;  %v359_v30 = vld [vmem:[#allocation2] sm:$0xff]  ;;  %v312_v43 = vrot.slane %v2296_v10, %v311_v42  ;;  %s462_s27 = scvt.s32.f32 %s461_s17  ;;  %p676_p13 = scmp.lt.s32.totalorder %s675_s8, 20 }
  0x40   : > { %1608 = vmatpush3.msra.mxu0 %v2294_v9  ;;  %293 = vbcast.lane.b32.xlu0 %v291_v11, 256  ;;  %v448_v32 = vmul.f32 0.9, %v359_v30  ;;  %s570_s7 = scvt.s32.f32 %s569_s29  ;;  %v319_v63 = vrot.slane %v2296_v10, %v318_v62  ;;  %s783_s13 = sadd.s32 3, %s2467_s14  ;;  %v1119_v62 = vld [vmem:[#allocation4 + $0x20] sm:$0xff] }
  0x41   : > { %1609 = vmatprep.subr.mxu0 %v2139_v3  ;;  %1642 = vmatprep.subr.mxu1 %v2139_v3  ;;  %v463_v47 = vstv %s462_s27  ;;  %s677_s9 = scalar_select %p676_p13, 1, 0 }
  0x42   : > { %1610 = vmatpush3.msra.mxu0 %v2303_v12  ;;  %1643 = vmatpush3.msra.mxu1 %v2294_v9  ;;  %v571_v53 = vstv %s570_s7  ;;  %p784_p0 = scmp.lt.s32.totalorder %s783_s13, 20  ;;  %s891_s27 = sadd.s32 4, %s2467_s14 }
  0x43   : > { %1611 = vmatprep.subr.mxu0 %v2139_v3  ;;  %1644 = vmatprep.subr.mxu1 %v2139_v3  ;;  %s678_s12 = scvt.s32.f32 %s677_s9  ;;  %p892_p1 = scmp.lt.s32.totalorder %s891_s27, 20 }
  0x44   : > { %1612 = vmatpush3.msra.mxu0 %v2309_v14  ;;  %300 = vbcast.lane.b32.xlu0 %v298_v13, 256  ;;  %s785_s16 = scalar_select %p784_p0, 1, 0 }
  0x45   : > { %1613 = vmatprep.subr.mxu0 %v2139_v3  ;;  %1645 = vmatpush3.msra.mxu1 %v2303_v12  ;;  %s893_s29 = scalar_select %p892_p1, 1, 0 }
  0x46   : > { %1614 = vmatpush3.msra.mxu0 %v2315_v15  ;;  %1646 = vmatprep.subr.mxu1 %v2139_v3  ;;  %s786_s17 = scvt.s32.f32 %s785_s16  ;;  %s999_s8 = sadd.s32 5, %s2467_s14 }
  0x47   : > { %1615 = vmatprep.subr.mxu0 %v2139_v3  ;;  %1647 = vmatpush3.msra.mxu1 %v2309_v14  ;;  %s894_s7 = scvt.s32.f32 %s893_s29  ;;  %p1000_p3 = scmp.lt.s32.totalorder %s999_s8, 20 }
  0x48   : > { %1616 = vmatpush3.msra.mxu0 %v2320_v16  ;;  %1648 = vmatprep.subr.mxu1 %v2139_v3  ;;  %s1107_s13 = sadd.s32 6, %s2467_s14  ;;  %s1215_s27 = sadd.s32 7, %s2467_s14 }
  0x49   : > { %1617 = vmatprep.subr.mxu0 %v2139_v3  ;;  %1649 = vmatpush3.msra.mxu1 %v2315_v15  ;;  %s1001_s9 = scalar_select %p1000_p3, 1, 0 }
  0x4a   : > { %1618 = vmatpush3.msra.mxu0 %v2326_v17  ;;  %1650 = vmatprep.subr.mxu1 %v2139_v3  ;;  %p1108_p5 = scmp.lt.s32.totalorder %s1107_s13, 20  ;;  %p1216_p7 = scmp.lt.s32.totalorder %s1215_s27, 20 }
  0x4b   : > { %1619 = vmatprep.subr.mxu0 %v2139_v3  ;;  %1651 = vmatpush3.msra.mxu1 %v2320_v16  ;;  %s1245_s13 = sshll.u32 %s2269_s10, 4  ;;  %s1262_s27 = sshll.u32 %s2271_s11, 4  ;;  %s2653_s13 = int_to_ptr.vmem [resolvable:$true] %s1245_s13  ;;  %s2655_s27 = int_to_ptr.vmem [resolvable:$true] %s1262_s27 }
  0x4c   : > { %1620 = vmatpush3.msra.mxu0 %v2332_v18  ;;  %1652 = vmatprep.subr.mxu1 %v2139_v3  ;;  %s1109_s16 = scalar_select %p1108_p5, 1, 0 }
  0x4d   : > { %1621 = vmatprep.subr.mxu0 %v2139_v3  ;;  %1653 = vmatpush3.msra.mxu1 %v2326_v17  ;;  %s1217_s29 = scalar_select %p1216_p7, 1, 0 }
  0x4e   : > { %1622 = vmatpush3.msra.mxu0 %v2338_v19  ;;  %1654 = vmatprep.subr.mxu1 %v2139_v3 }
  0x4f   : > { %1623 = vmatprep.subr.mxu0 %v2139_v3  ;;  %1655 = vmatpush3.msra.mxu1 %v2332_v18  ;;  %s1218_s8 = scvt.s32.f32 %s1217_s29 }
  0x50   : > { %1624 = vmatpush3.msra.mxu0 %v2344_v20  ;;  %1656 = vmatprep.subr.mxu1 %v2139_v3 }
  0x51   : > { %1625 = vmatprep.subr.mxu0 %v2139_v3  ;;  %1657 = vmatpush3.msra.mxu1 %v2338_v19 }
  0x52   : > { %1626 = vmatpush3.msra.mxu0 %v2350_v21  ;;  %1658 = vmatprep.subr.mxu1 %v2139_v3 }
  0x53   : > { %1627 = vmatprep.subr.mxu0 %v2139_v3  ;;  %1659 = vmatpush3.msra.mxu1 %v2344_v20 }
  0x54   : > { %1628 = vmatpush3.msra.mxu0 %v2356_v22  ;;  %1660 = vmatprep.subr.mxu1 %v2139_v3 }
  0x55   : > { %1629 = vmatprep.subr.mxu0 %v2139_v3  ;;  %1661 = vmatpush3.msra.mxu1 %v2350_v21 }
  0x56   : > { %1630 = vmatpush3.msra.mxu0 %v2362_v23  ;;  %1662 = vmatprep.subr.mxu1 %v2139_v3 }
  0x57   : > { %1631 = vmatprep.subr.mxu0 %v2139_v3  ;;  %1663 = vmatpush3.msra.mxu1 %v2356_v22 }
  0x58   : > { %1632 = vmatpush3.msra.mxu0 %v2368_v24  ;;  %1664 = vmatprep.subr.mxu1 %v2139_v3 }
  0x59   : > { %1634 = vmatmul.mubr.f32.vlgmr.msra.gmra.mxu0 %v360_v25  ;;  %1665 = vmatpush3.msra.mxu1 %v2362_v23  ;;  %v679_v25 = vstv %s678_s12  ;;  %s1002_s12 = scvt.s32.f32 %s1001_s9  ;;  %s1464_s9 = sshll.u32 %s2125_s21, 10 }
  0x5a   : > { %1666 = vmatprep.subr.mxu1 %v2139_v3  ;;  %1668 = vmatprep.mubr.msk.f32.mxu1 %vm2140_vm0, %v2139_v3  ;;  %s2644_s14 = scalar_lea.hbm %s2753_s4, %s1464_s9 }
  0x5b   : > { %1667 = vmatpush3.msra.mxu1 %v2368_v24  ;;  %1671 = vmatprep.subr.mxu0 %v2139_v3 }
  0x5c   : > { %1672 = vmatpush3.msra.mxu0 %v2274_v1  ;;  %1703 = vmatprep.mubr.msk.f32.mxu0 %vm2140_vm0, %v2139_v3 }
  0x5d   : > { %1673 = vmatprep.subr.mxu0 %v2139_v3  ;;  %1706 = vmatprep.subr.mxu1 %v2139_v3 }
  0x5e   : > { %1674 = vmatpush3.msra.mxu0 %v2277_v4  ;;  %307 = vbcast.lane.b32.xlu1 %v305_v27, 256 }
  0x5f   : > { %1675 = vmatprep.subr.mxu0 %v2139_v3  ;;  %321 = vbcast.lane.b32.xlu0 %v319_v63, 256  ;;  %v1118_v63 = vld [vmem:[#allocation4 + $0x18] sm:$0xff] }
  0x60   : > { %1676 = vmatpush3.msra.mxu0 %v2286_v6 }
  0x61   : > { %1677 = vmatprep.subr.mxu0 %v2139_v3 }
  0x62   : > { %1678 = vmatpush3.msra.mxu0 %v2294_v9  ;;  %314 = vbcast.lane.b32.xlu1 %v312_v43, 256  ;;  %v787_v43 = vstv %s786_s17  ;;  %s1110_s17 = scvt.s32.f32 %s1109_s16 }
  0x63   : > { %1679 = vmatprep.subr.mxu0 %v2139_v3 }
  0x64   : > { %1680 = vmatpush3.msra.mxu0 %v2303_v12 }
  0x65   : > { %1681 = vmatprep.subr.mxu0 %v2139_v3 }
  0x66   : > { %1682 = vmatpush3.msra.mxu0 %v2309_v14 }
  0x67   : > { %1683 = vmatprep.subr.mxu0 %v2139_v3 }
  0x68   : > { %1684 = vmatpush3.msra.mxu0 %v2315_v15 }
  0x69   : > { %1685 = vmatprep.subr.mxu0 %v2139_v3 }
  0x6a   : > { %1686 = vmatpush3.msra.mxu0 %v2320_v16 }
  0x6b   : > { %1687 = vmatprep.subr.mxu0 %v2139_v3 }
  0x6c   : > { %1688 = vmatpush3.msra.mxu0 %v2326_v17 }
  0x6d   : > { %1689 = vmatprep.subr.mxu0 %v2139_v3 }
  0x6e   : > { %1690 = vmatpush3.msra.mxu0 %v2332_v18 }
  0x6f   : > { %1691 = vmatprep.subr.mxu0 %v2139_v3 }
  0x70   : > { %1692 = vmatpush3.msra.mxu0 %v2338_v19 }
  0x71   : > { %1693 = vmatprep.subr.mxu0 %v2139_v3 }
  0x72   : > { %1694 = vmatpush3.msra.mxu0 %v2344_v20 }
  0x73   : > { %1695 = vmatprep.subr.mxu0 %v2139_v3 }
  0x74   : > { %1696 = vmatpush3.msra.mxu0 %v2350_v21 }
  0x75   : > { %1697 = vmatprep.subr.mxu0 %v2139_v3 }
  0x76   : > { %1698 = vmatpush3.msra.mxu0 %v2356_v22 }
  0x77   : > { %1699 = vmatprep.subr.mxu0 %v2139_v3 }
  0x78   : > { %1700 = vmatpush3.msra.mxu0 %v2362_v23 }
  0x79   : > { %1701 = vmatprep.subr.mxu0 %v2139_v3 }
  0x7a   : > { %1702 = vmatpush3.msra.mxu0 %v2368_v24 }
  0x7b   : > { %1741 = vmatprep.subr.mxu0 %v2139_v3 }
  0xb2   : > { %v294_v29 = vpop.permute.xlu0 %293 }
  0xb3   : > { %v351_v31 = vmul.f32 %v2423_v28, %v294_v29 }
  0xb5   : > { %v449_v33 = vadd.f32 %v448_v32, %v351_v31 }
  0xb6   : > { %v301_v44 = vpop.permute.xlu0 %300 }
  0xb7   : > { %v352_v45 = vmul.f32 %v2423_v28, %v301_v44 }
  0xd0   : > { %v308_v0 = vpop.permute.xlu1 %307 }
  0xd1   : > { %v353_v2 = vmul.f32 %v2423_v28, %v308_v0  ;;  %v1117_v0 = vld [vmem:[#allocation4 + $0x10] sm:$0xff] }
 0x119   : > { %v444_v34 = vpop.f32.mrf.mxu0 }
 0x11a   : > { %v450_v35 = vadd.f32 %v449_v33, %v444_v34  ;;  %v325_v34 = vsub.s32 5, %v2282_v5 }
 0x11b   : > { %v1635_v36 = vpop.f32.mrf.mxu0 }
 0x11c   : > { %vm451_vm1 = vcmp.ge.f32.partialorder %v450_v35, 1.0  ;;  %v315_v36 = vpop.permute.xlu1 %314 }
 0x11d   : > { %v1424_v37 = vsel %vm451_vm1, 1.0, %v2139_v3  ;;  %1669 = vmatmul.mubr.msk.f32.vlgmr.msra.gmra.mxu1 %vm451_vm1, %v2141_v38 }
 0x11e   : > { %v454_v39 = vsub.f32 1.0, %v1424_v37  ;;  %v456_v40 = vpack.c.bf16 %v1424_v37, %v1424_v37  ;;  %1707 = vmatpush3.msra.mxu1 %v2274_v1  ;;  %1738 = vmatprep.mubr.msk.f32.mxu1 %vm2140_vm0, %v2139_v3  ;;  %v464_v50 = vmul.f32 %v1424_v37, %v463_v47  ;;  %v354_v37 = vmul.f32 %v2423_v28, %v315_v36  ;;  %v1115_v36 = vld [vmem:[#allocation4] sm:$0xff] }
 0x11f   : > { %1708 = vmatprep.subr.mxu1 %v2139_v3 }
 0x120   : > { %v455_v41 = vmul.f32 %v454_v39, %v450_v35  ;;  %457 = vst [vmem:[%s2269_s10] sm:$0xf] %v456_v40  ;;  %1709 = vmatpush3.msra.mxu1 %v2277_v4  ;;  %v465_v56 = vadd.f32 %v464_v50, %v459_v52  ;;  %v326_v35 = vrot.slane %v2296_v10, %v325_v34  ;;  %v1130_v52 = vld [vmem:[#allocation4 + $0x78] sm:$0xff] }
 0x121   : > { %1710 = vmatprep.subr.mxu1 %v2139_v3 }
 0x122   : > { %458 = vst [vmem:[%s2271_s11] sm:$0xff] %v455_v41  ;;  %1711 = vmatpush3.msra.mxu1 %v2286_v6  ;;  %v553_v46 = vmul.f32 0.9, %v455_v41  ;;  %328 = vbcast.lane.b32.xlu1 %v326_v35, 256  ;;  %v1116_v35 = vld [vmem:[#allocation4 + $0x8] sm:$0xff] }
 0x123   : > { %1712 = vmatprep.subr.mxu1 %v2139_v3 }
 0x124   : > { %1713 = vmatpush3.msra.mxu1 %v2294_v9  ;;  %v554_v48 = vadd.f32 %v553_v46, %v352_v45 }
 0x125   : > { %1714 = vmatprep.subr.mxu1 %v2139_v3 }
 0x126   : > { %1715 = vmatpush3.msra.mxu1 %v2303_v12 }
 0x127   : > { %1716 = vmatprep.subr.mxu1 %v2139_v3 }
 0x128   : > { %1717 = vmatpush3.msra.mxu1 %v2309_v14 }
 0x129   : > { %1718 = vmatprep.subr.mxu1 %v2139_v3 }
 0x12a   : > { %1719 = vmatpush3.msra.mxu1 %v2315_v15 }
 0x12b   : > { %1720 = vmatprep.subr.mxu1 %v2139_v3 }
 0x12c   : > { %1721 = vmatpush3.msra.mxu1 %v2320_v16 }
 0x12d   : > { %1722 = vmatprep.subr.mxu1 %v2139_v3 }
 0x12e   : > { %1723 = vmatpush3.msra.mxu1 %v2326_v17 }
 0x12f   : > { %1724 = vmatprep.subr.mxu1 %v2139_v3 }
 0x130   : > { %1725 = vmatpush3.msra.mxu1 %v2332_v18 }
 0x131   : > { %1726 = vmatprep.subr.mxu1 %v2139_v3 }
 0x132   : > { %1727 = vmatpush3.msra.mxu1 %v2338_v19 }
 0x133   : > { %1728 = vmatprep.subr.mxu1 %v2139_v3 }
 0x134   : > { %1729 = vmatpush3.msra.mxu1 %v2344_v20 }
 0x135   : > { %1730 = vmatprep.subr.mxu1 %v2139_v3 }
 0x136   : > { %1731 = vmatpush3.msra.mxu1 %v2350_v21 }
 0x137   : > { %1732 = vmatprep.subr.mxu1 %v2139_v3 }
 0x138   : > { %1733 = vmatpush3.msra.mxu1 %v2356_v22 }
 0x139   : > { %1734 = vmatprep.subr.mxu1 %v2139_v3 }
 0x13a   : > { %1735 = vmatpush3.msra.mxu1 %v2362_v23 }
 0x13b   : > { %1736 = vmatprep.subr.mxu1 %v2139_v3 }
 0x13c   : > { %1737 = vmatpush3.msra.mxu1 %v2368_v24 }
 0x13d   : > { %1776 = vmatprep.subr.mxu1 %v2139_v3 }
 0x1dd   : > { %v549_v49 = vpop.f32.mrf.mxu1 }
 0x1de   : > { %v555_v51 = vadd.f32 %v554_v48, %v549_v49 }
 0x1df   : > { %v1670_v54 = vpop.f32.mrf.mxu1 }
 0x1e0   : > { %vm556_vm2 = vcmp.ge.f32.partialorder %v555_v51, 1.0 }
 0x1e1   : > { %v1426_v55 = vsel %vm556_vm2, 1.0, %v2139_v3  ;;  %1704 = vmatmul.mubr.msk.f32.vlgmr.msra.gmra.mxu0 %vm556_vm2, %v2141_v38 }
 0x1e2   : > { %v559_v57 = vsub.f32 1.0, %v1426_v55  ;;  %v561_v58 = vpack.c.bf16 %v1426_v55, %v1426_v55  ;;  %v572_v59 = vmul.f32 %v1426_v55, %v571_v53  ;;  %1742 = vmatpush3.msra.mxu0 %v2274_v1  ;;  %1773 = vmatprep.mubr.msk.f32.mxu0 %vm2140_vm0, %v2139_v3  ;;  %v1129_v53 = vld [vmem:[#allocation4 + $0x70] sm:$0xff]  ;;  %v1128_v55 = vld [vmem:[#allocation4 + $0x68] sm:$0xff] }
 0x1e3   : > { %1743 = vmatprep.subr.mxu0 %v2139_v3 }
 0x1e4   : > { %v560_v60 = vmul.f32 %v559_v57, %v555_v51  ;;  %1427 = vst [vmem:[%s2269_s10 + $0x4] sm:$0xf] %v561_v58  ;;  %v573_v61 = vadd.f32 %v572_v59, %v465_v56  ;;  %1744 = vmatpush3.msra.mxu0 %v2277_v4  ;;  %v339_v51 = vsub.s32 7, %v2282_v5  ;;  %v1127_v56 = vld [vmem:[#allocation4 + $0x60] sm:$0xff]  ;;  %v1126_v57 = vld [vmem:[#allocation4 + $0x58] sm:$0xff] }
 0x1e5   : > { %1745 = vmatprep.subr.mxu0 %v2139_v3  ;;  %v1123_v58 = vld [vmem:[#allocation4 + $0x40] sm:$0xff]  ;;  %v1122_v59 = vld [vmem:[#allocation4 + $0x38] sm:$0xff] }
 0x1e6   : > { %1428 = vst [vmem:[%s2271_s11 + $0x8] sm:$0xff] %v560_v60  ;;  %1746 = vmatpush3.msra.mxu0 %v2286_v6  ;;  %v661_v7 = vmul.f32 0.9, %v560_v60  ;;  %v340_v54 = vrot.slane %v2296_v10, %v339_v51  ;;  %v1121_v60 = vld [vmem:[#allocation4 + $0x30] sm:$0xff] }
 0x1e7   : > { %1747 = vmatprep.subr.mxu0 %v2139_v3 }
 0x1e8   : > { %1748 = vmatpush3.msra.mxu0 %v2294_v9  ;;  %v662_v8 = vadd.f32 %v661_v7, %v353_v2  ;;  %342 = vbcast.lane.b32.xlu1 %v340_v54, 256  ;;  %v329_v2 = vpop.permute.xlu1 %328 }
 0x1e9   : > { %1749 = vmatprep.subr.mxu0 %v2139_v3  ;;  %v356_v7 = vmul.f32 %v2423_v28, %v329_v2 }
 0x1ea   : > { %1750 = vmatpush3.msra.mxu0 %v2303_v12 }
 0x1eb   : > { %1751 = vmatprep.subr.mxu0 %v2139_v3 }
 0x1ec   : > { %1752 = vmatpush3.msra.mxu0 %v2309_v14 }
 0x1ed   : > { %1753 = vmatprep.subr.mxu0 %v2139_v3 }
 0x1ee   : > { %1754 = vmatpush3.msra.mxu0 %v2315_v15 }
 0x1ef   : > { %1755 = vmatprep.subr.mxu0 %v2139_v3 }
 0x1f0   : > { %1756 = vmatpush3.msra.mxu0 %v2320_v16 }
 0x1f1   : > { %1757 = vmatprep.subr.mxu0 %v2139_v3 }
 0x1f2   : > { %1758 = vmatpush3.msra.mxu0 %v2326_v17 }
 0x1f3   : > { %1759 = vmatprep.subr.mxu0 %v2139_v3 }
 0x1f4   : > { %1760 = vmatpush3.msra.mxu0 %v2332_v18 }
 0x1f5   : > { %1761 = vmatprep.subr.mxu0 %v2139_v3 }
 0x1f6   : > { %1762 = vmatpush3.msra.mxu0 %v2338_v19 }
 0x1f7   : > { %1763 = vmatprep.subr.mxu0 %v2139_v3 }
 0x1f8   : > { %1764 = vmatpush3.msra.mxu0 %v2344_v20 }
 0x1f9   : > { %1765 = vmatprep.subr.mxu0 %v2139_v3 }
 0x1fa   : > { %1766 = vmatpush3.msra.mxu0 %v2350_v21 }
 0x1fb   : > { %1767 = vmatprep.subr.mxu0 %v2139_v3 }
 0x1fc   : > { %1768 = vmatpush3.msra.mxu0 %v2356_v22 }
 0x1fd   : > { %1769 = vmatprep.subr.mxu0 %v2139_v3 }
 0x1fe   : > { %1770 = vmatpush3.msra.mxu0 %v2362_v23 }
 0x1ff   : > { %1771 = vmatprep.subr.mxu0 %v2139_v3 }
 0x200   : > { %1772 = vmatpush3.msra.mxu0 %v2368_v24 }
 0x201   : > { %1811 = vmatprep.subr.mxu0 %v2139_v3 }
 0x2a1   : > { %v657_v11 = vpop.f32.mrf.mxu0 }
 0x2a2   : > { %v663_v13 = vadd.f32 %v662_v8, %v657_v11 }
 0x2a3   : > { %v1705_v26 = vpop.f32.mrf.mxu0 }
 0x2a4   : > { %vm664_vm3 = vcmp.ge.f32.partialorder %v663_v13, 1.0  ;;  %v1003_v26 = vstv %s1002_s12  ;;  %s1463_s12 = sshll.u32 %s2125_s21, 9  ;;  %s2142_s21 = smov [#allocation10]  }
 0x2a5   : > { %v1430_v27 = vsel %vm664_vm3, 1.0, %v2139_v3  ;;  %1739 = vmatmul.mubr.msk.f32.vlgmr.msra.gmra.mxu1 %vm664_vm3, %v2141_v38  ;;  %s2650_s29 = scalar_lea.hbm %s2752_s3, %s1463_s12  ;;  %s1278_s16 = sshll.u32 %s2142_s21, 4  ;;  %s2658_s16 = int_to_ptr.vmem [resolvable:$true] %s1278_s16 }
 0x2a6   : > { %v667_v29 = vsub.f32 1.0, %v1430_v27  ;;  %v669_v30 = vpack.c.bf16 %v1430_v27, %v1430_v27  ;;  %v680_v31 = vmul.f32 %v1430_v27, %v679_v25  ;;  %1777 = vmatpush3.msra.mxu1 %v2274_v1  ;;  %1808 = vmatprep.mubr.msk.f32.mxu1 %vm2140_vm0, %v2139_v3 }
 0x2a7   : > { %1778 = vmatprep.subr.mxu1 %v2139_v3 }
 0x2a8   : > { %v668_v32 = vmul.f32 %v667_v29, %v663_v13  ;;  %1431 = vst [vmem:[%s2269_s10 + $0x8] sm:$0xf] %v669_v30  ;;  %v681_v33 = vadd.f32 %v680_v31, %v573_v61  ;;  %1779 = vmatpush3.msra.mxu1 %v2277_v4  ;;  %v1120_v61 = vld [vmem:[#allocation4 + $0x28] sm:$0xff] }
 0x2a9   : > { %1780 = vmatprep.subr.mxu1 %v2139_v3 }
 0x2aa   : > { %1432 = vst [vmem:[%s2271_s11 + $0x10] sm:$0xff] %v668_v32  ;;  %1781 = vmatpush3.msra.mxu1 %v2286_v6  ;;  %v769_v39 = vmul.f32 0.9, %v668_v32 }
 0x2ab   : > { %1782 = vmatprep.subr.mxu1 %v2139_v3 }
 0x2ac   : > { %1783 = vmatpush3.msra.mxu1 %v2294_v9  ;;  %v770_v40 = vadd.f32 %v769_v39, %v354_v37 }
 0x2ad   : > { %1784 = vmatprep.subr.mxu1 %v2139_v3 }
 0x2ae   : > { %1785 = vmatpush3.msra.mxu1 %v2303_v12 }
 0x2af   : > { %1786 = vmatprep.subr.mxu1 %v2139_v3 }
 0x2b0   : > { %1787 = vmatpush3.msra.mxu1 %v2309_v14 }
 0x2b1   : > { %1788 = vmatprep.subr.mxu1 %v2139_v3 }
 0x2b2   : > { %1789 = vmatpush3.msra.mxu1 %v2315_v15 }
 0x2b3   : > { %1790 = vmatprep.subr.mxu1 %v2139_v3 }
 0x2b4   : > { %1791 = vmatpush3.msra.mxu1 %v2320_v16 }
 0x2b5   : > { %1792 = vmatprep.subr.mxu1 %v2139_v3 }
 0x2b6   : > { %1793 = vmatpush3.msra.mxu1 %v2326_v17 }
 0x2b7   : > { %1794 = vmatprep.subr.mxu1 %v2139_v3 }
 0x2b8   : > { %1795 = vmatpush3.msra.mxu1 %v2332_v18 }
 0x2b9   : > { %1796 = vmatprep.subr.mxu1 %v2139_v3 }
 0x2ba   : > { %1797 = vmatpush3.msra.mxu1 %v2338_v19 }
 0x2bb   : > { %1798 = vmatprep.subr.mxu1 %v2139_v3 }
 0x2bc   : > { %1799 = vmatpush3.msra.mxu1 %v2344_v20 }
 0x2bd   : > { %1800 = vmatprep.subr.mxu1 %v2139_v3 }
 0x2be   : > { %1801 = vmatpush3.msra.mxu1 %v2350_v21 }
 0x2bf   : > { %1802 = vmatprep.subr.mxu1 %v2139_v3 }
 0x2c0   : > { %1803 = vmatpush3.msra.mxu1 %v2356_v22 }
 0x2c1   : > { %1804 = vmatprep.subr.mxu1 %v2139_v3 }
 0x2c2   : > { %1805 = vmatpush3.msra.mxu1 %v2362_v23 }
 0x2c3   : > { %1806 = vmatprep.subr.mxu1 %v2139_v3 }
 0x2c4   : > { %1807 = vmatpush3.msra.mxu1 %v2368_v24 }
 0x2c5   : > { %1846 = vmatprep.subr.mxu1 %v2139_v3 }
 0x365   : > { %v765_v41 = vpop.f32.mrf.mxu1 }
 0x366   : > { %v771_v42 = vadd.f32 %v770_v40, %v765_v41 }
 0x367   : > { %v1740_v44 = vpop.f32.mrf.mxu1 }
 0x368   : > { %vm772_vm4 = vcmp.ge.f32.partialorder %v771_v42, 1.0  ;;  %v1111_v44 = vstv %s1110_s17 }
 0x369   : > { %v1434_v45 = vsel %vm772_vm4, 1.0, %v2139_v3  ;;  %1774 = vmatmul.mubr.msk.f32.vlgmr.msra.gmra.mxu0 %vm772_vm4, %v2141_v38 }
 0x36a   : > { %v775_v46 = vsub.f32 1.0, %v1434_v45  ;;  %v777_v47 = vpack.c.bf16 %v1434_v45, %v1434_v45  ;;  %v788_v48 = vmul.f32 %v1434_v45, %v787_v43  ;;  %1812 = vmatpush3.msra.mxu0 %v2274_v1  ;;  %1843 = vmatprep.mubr.msk.f32.mxu0 %vm2140_vm0, %v2139_v3  ;;  %v332_v1 = vsub.s32 6, %v2282_v5  ;;  %v1125_v5 = vld [vmem:[#allocation4 + $0x50] sm:$0xff] }
 0x36b   : > { %1813 = vmatprep.subr.mxu0 %v2139_v3 }
 0x36c   : > { %v776_v49 = vmul.f32 %v775_v46, %v771_v42  ;;  %1435 = vst [vmem:[%s2269_s10 + $0xc] sm:$0xf] %v777_v47  ;;  %v789_v50 = vadd.f32 %v788_v48, %v681_v33  ;;  %1814 = vmatpush3.msra.mxu0 %v2277_v4  ;;  %v333_v4 = vrot.slane %v2296_v10, %v332_v1  ;;  %v1124_v10 = vld [vmem:[#allocation4 + $0x48] sm:$0xff] }
 0x36d   : > { %1815 = vmatprep.subr.mxu0 %v2139_v3 }
 0x36e   : > { %1436 = vst [vmem:[%s2271_s11 + $0x18] sm:$0xff] %v776_v49  ;;  %1816 = vmatpush3.msra.mxu0 %v2286_v6  ;;  %335 = vbcast.lane.b32.xlu0 %v333_v4, 256  ;;  %v322_v6 = vpop.permute.xlu0 %321  ;;  %v343_v4 = vpop.permute.xlu1 %342 }
 0x36f   : > { %1817 = vmatprep.subr.mxu0 %v2139_v3 }
 0x370   : > { %1818 = vmatpush3.msra.mxu0 %v2294_v9  ;;  %v355_v9 = vmul.f32 %v2423_v28, %v322_v6  ;;  %v358_v6 = vmul.f32 %v2423_v28, %v343_v4 }
 0x371   : > { %1819 = vmatprep.subr.mxu0 %v2139_v3 }
 0x372   : > { %1820 = vmatpush3.msra.mxu0 %v2303_v12  ;;  %v877_v12 = vmul.f32 0.9, %v776_v49 }
 0x373   : > { %1821 = vmatprep.subr.mxu0 %v2139_v3 }
 0x374   : > { %1822 = vmatpush3.msra.mxu0 %v2309_v14  ;;  %v878_v14 = vadd.f32 %v877_v12, %v355_v9 }
 0x375   : > { %1823 = vmatprep.subr.mxu0 %v2139_v3 }
 0x376   : > { %1824 = vmatpush3.msra.mxu0 %v2315_v15 }
 0x377   : > { %1825 = vmatprep.subr.mxu0 %v2139_v3 }
 0x378   : > { %1826 = vmatpush3.msra.mxu0 %v2320_v16 }
 0x379   : > { %1827 = vmatprep.subr.mxu0 %v2139_v3 }
 0x37a   : > { %1828 = vmatpush3.msra.mxu0 %v2326_v17  ;;  %v895_v17 = vstv %s894_s7  ;;  %s1995_s7 = scalar_lea.vmem %s2653_s13, 512 }
 0x37b   : > { %1829 = vmatprep.subr.mxu0 %v2139_v3  ;;  %p1996_p6 = scmp.ne.s32.totalorder %s2653_s13, %s1995_s7 }
 0x37c   : > { %1830 = vmatpush3.msra.mxu0 %v2332_v18 }
 0x37d   : > { %1831 = vmatprep.subr.mxu0 %v2139_v3  ;;  %p1997_p9 = pnand %p1996_p6, %p2224_p4 }
 0x37e   : > { %1832 = vmatpush3.msra.mxu0 %v2338_v19 }
 0x37f   : > { %1833 = vmatprep.subr.mxu0 %v2139_v3  ;;  %p1998_p2 = pneg %p1997_p9 }
 0x380   : > { %1834 = vmatpush3.msra.mxu0 %v2344_v20 }
 0x381   : > { %1835 = vmatprep.subr.mxu0 %v2139_v3 }
 0x382   : > { %1836 = vmatpush3.msra.mxu0 %v2350_v21 }
 0x383   : > { %1837 = vmatprep.subr.mxu0 %v2139_v3 }
 0x384   : > { %1838 = vmatpush3.msra.mxu0 %v2356_v22 }
 0x385   : > { %1839 = vmatprep.subr.mxu0 %v2139_v3 }
 0x386   : > { %1840 = vmatpush3.msra.mxu0 %v2362_v23 }
 0x387   : > { %1841 = vmatprep.subr.mxu0 %v2139_v3 }
 0x388   : > { %1842 = vmatpush3.msra.mxu0 %v2368_v24 }
 0x3e0   : > { %v336_v37 = vpop.permute.xlu0 %335 }
 0x3e1   : > { %v357_v39 = vmul.f32 %v2423_v28, %v336_v37 }
 0x429   : > { %v873_v15 = vpop.f32.mrf.mxu0 }
 0x42a   : > { %v879_v16 = vadd.f32 %v878_v14, %v873_v15 }
 0x42b   : > { %v1775_v18 = vpop.f32.mrf.mxu0 }
 0x42c   : > { %vm880_vm5 = vcmp.ge.f32.partialorder %v879_v16, 1.0 }
 0x42d   : > { %v1438_v19 = vsel %vm880_vm5, 1.0, %v2139_v3  ;;  %1809 = vmatmul.mubr.msk.f32.vlgmr.msra.gmra.mxu1 %vm880_vm5, %v2141_v38 }
 0x42e   : > { %v883_v20 = vsub.f32 1.0, %v1438_v19  ;;  %v885_v21 = vpack.c.bf16 %v1438_v19, %v1438_v19  ;;  %v896_v22 = vmul.f32 %v1438_v19, %v895_v17  ;;  %1878 = vmatprep.mubr.msk.f32.mxu1 %vm2140_vm0, %v2139_v3  ;;  %1847 = vmatpush3.msra.mxu1 %v1130_v52 }
 0x42f   : > { %1848 = vmatprep.subr.mxu1 %v2139_v3 }
 0x430   : > { %v884_v23 = vmul.f32 %v883_v20, %v879_v16  ;;  %1439 = vst [vmem:[%s2269_s10 + $0x10] sm:$0xf] %v885_v21  ;;  %v2602_v24 = vadd.f32 %v896_v22, %v789_v50  ;;  %1849 = vmatpush3.msra.mxu1 %v1129_v53  ;;  %v1219_v16 = vstv %s1218_s8  ;;  %s2143_s8 = smov [#allocation7]  }
 0x431   : > { %1850 = vmatprep.subr.mxu1 %v2139_v3  ;;  %s1999_s9 = sshll.u32 %s2143_s8, 4  ;;  %s2000_s9 = int_to_ptr.vmem [resolvable:$false] %s1999_s9 }
 0x432   : > { %1440 = vst [vmem:[%s2271_s11 + $0x20] sm:$0xff] %v884_v23  ;;  %1851 = vmatpush3.msra.mxu1 %v1128_v55  ;;  %v985_v8 = vmul.f32 0.9, %v884_v23  ;;  %s2001_s12 = scalar_lea.vmem %s2000_s9, 1024  ;;  %p2002_p10 = scmp.lt.s32.totalorder %s2653_s13, %s2000_s9 }
 0x433   : > { %1852 = vmatprep.subr.mxu1 %v2139_v3  ;;  %p2003_p11 = scmp.lt.s32.totalorder %s2001_s12, %s1995_s7 }
 0x434   : > { %1853 = vmatpush3.msra.mxu1 %v1127_v56  ;;  %v986_v11 = vadd.f32 %v985_v8, %v356_v7 }
 0x435   : > { %1854 = vmatprep.subr.mxu1 %v2139_v3  ;;  %p2004_p12 = por %p2003_p11, %p2002_p10 }
 0x436   : > { %1855 = vmatpush3.msra.mxu1 %v1126_v57 }
 0x437   : > { %1856 = vmatprep.subr.mxu1 %v2139_v3  ;;  %p2005_p13 = pnand %p2004_p12, %p1998_p2 }
 0x438   : > { %1857 = vmatpush3.msra.mxu1 %v1125_v5 }
 0x439   : > { %1858 = vmatprep.subr.mxu1 %v2139_v3 }
 0x43a   : > { %1859 = vmatpush3.msra.mxu1 %v1124_v10 }
 0x43b   : > { %1860 = vmatprep.subr.mxu1 %v2139_v3 }
 0x43c   : > { %1861 = vmatpush3.msra.mxu1 %v1123_v58 }
 0x43d   : > { %1862 = vmatprep.subr.mxu1 %v2139_v3 }
 0x43e   : > { %1863 = vmatpush3.msra.mxu1 %v1122_v59 }
 0x43f   : > { %1864 = vmatprep.subr.mxu1 %v2139_v3 }
 0x440   : > { %1865 = vmatpush3.msra.mxu1 %v1121_v60 }
 0x441   : > { %1866 = vmatprep.subr.mxu1 %v2139_v3 }
 0x442   : > { %1867 = vmatpush3.msra.mxu1 %v1120_v61 }
 0x443   : > { %1868 = vmatprep.subr.mxu1 %v2139_v3 }
 0x444   : > { %1869 = vmatpush3.msra.mxu1 %v1119_v62 }
 0x445   : > { %1870 = vmatprep.subr.mxu1 %v2139_v3 }
 0x446   : > { %1871 = vmatpush3.msra.mxu1 %v1118_v63 }
 0x447   : > { %1872 = vmatprep.subr.mxu1 %v2139_v3 }
 0x448   : > { %1873 = vmatpush3.msra.mxu1 %v1117_v0 }
 0x449   : > { %1874 = vmatprep.subr.mxu1 %v2139_v3 }
 0x44a   : > { %1875 = vmatpush3.msra.mxu1 %v1116_v35 }
 0x44b   : > { %1876 = vmatprep.subr.mxu1 %v2139_v3 }
 0x44c   : > { %1877 = vmatpush3.msra.mxu1 %v1115_v36 }
 0x4ed   : > { %v981_v13 = vpop.f32.mrf.mxu1 }
 0x4ee   : > { %v987_v25 = vadd.f32 %v986_v11, %v981_v13 }
 0x4ef   : > { %v1810_v27 = vpop.f32.mrf.mxu1 }
 0x4f0   : > { %vm988_vm6 = vcmp.ge.f32.partialorder %v987_v25, 1.0 }
 0x4f1   : > { %v1442_v29 = vsel %vm988_vm6, 1.0, %v2139_v3  ;;  %1844 = vmatmul.mubr.msk.f32.vlgmr.msra.gmra.mxu0 %vm988_vm6, %v2141_v38 }
 0x4f2   : > { %v991_v30 = vsub.f32 1.0, %v1442_v29  ;;  %v993_v31 = vpack.c.bf16 %v1442_v29, %v1442_v29  ;;  %v1004_v32 = vmul.f32 %v1442_v29, %v1003_v26 }
 0x4f4   : > { %v992_v33 = vmul.f32 %v991_v30, %v987_v25  ;;  %1443 = vst [vmem:[%s2269_s10 + $0x14] sm:$0xf] %v993_v31  ;;  %v1005_v34 = vadd.f32 %v1004_v32, %v2602_v24 }
 0x4f6   : > { %1444 = vst [vmem:[%s2271_s11 + $0x28] sm:$0xff] %v992_v33  ;;  %v1093_v40 = vmul.f32 0.9, %v992_v33 }
 0x4f8   : > { %v1094_v41 = vadd.f32 %v1093_v40, %v357_v39 }
 0x5b1   : > { %v1089_v42 = vpop.f32.mrf.mxu0 }
 0x5b2   : > { %v1095_v43 = vadd.f32 %v1094_v41, %v1089_v42 }
 0x5b3   : > { %v1845_v45 = vpop.f32.mrf.mxu0 }
 0x5b4   : > { %vm1096_vm7 = vcmp.ge.f32.partialorder %v1095_v43, 1.0 }
 0x5b5   : > { %v1446_v46 = vsel %vm1096_vm7, 1.0, %v2139_v3  ;;  %1879 = vmatmul.mubr.msk.f32.vlgmr.msra.gmra.mxu1 %vm1096_vm7, %v2141_v38 }
 0x5b6   : > { %v1099_v47 = vsub.f32 1.0, %v1446_v46  ;;  %v1101_v48 = vpack.c.bf16 %v1446_v46, %v1446_v46  ;;  %v1112_v49 = vmul.f32 %v1446_v46, %v1111_v44 }
 0x5b8   : > { %v1100_v50 = vmul.f32 %v1099_v47, %v1095_v43  ;;  %1447 = vst [vmem:[%s2269_s10 + $0x18] sm:$0xf] %v1101_v48  ;;  %v1113_v1 = vadd.f32 %v1112_v49, %v1005_v34 }
 0x5ba   : > { %1448 = vst [vmem:[%s2271_s11 + $0x30] sm:$0xff] %v1100_v50  ;;  %v1201_v9 = vmul.f32 0.9, %v1100_v50 }
 0x5bc   : > { %v1202_v38 = vadd.f32 %v1201_v9, %v358_v6 }
 0x675   : > { %v1197_v12 = vpop.f32.mrf.mxu1 }
 0x676   : > { %v1203_v14 = vadd.f32 %v1202_v38, %v1197_v12 }
 0x677   : > { %v1880_v15 = vpop.f32.mrf.mxu1 }
 0x678   : > { %vm1204_vm8 = vcmp.ge.f32.partialorder %v1203_v14, 1.0 }
 0x679   : > { %v1450_v28 = vsel %vm1204_vm8, 1.0, %v2139_v3 }
 0x67a   : > { %v1207_v17 = vsub.f32 1.0, %v1450_v28  ;;  %v1209_v18 = vpack.c.bf16 %v1450_v28, %v1450_v28  ;;  %1224 = vst [vmem:[#allocation3] sm:$0xff] %v1450_v28  ;;  %v1220_v19 = vmul.f32 %v1450_v28, %v1219_v16 }
 0x67c   : > { %v1208_v20 = vmul.f32 %v1207_v17, %v1203_v14  ;;  %1451 = vst [vmem:[%s2269_s10 + $0x1c] sm:$0xf] %v1209_v18  ;;  %v1221_v21 = vadd.f32 %v1220_v19, %v1113_v1 }
 0x67d   : > { %2008 = shalt.err (!%p2005_p13)
}
 0x67e   : > { %s2009_s10 = scalar_lea.hbm %s2650_s29, 512  ;;  %s2013_s8 = scalar_lea.hbm %s2752_s3, 1536 }
 0x67f   : > { %p2010_p0 = scmp.ne.s32.totalorder %s2650_s29, %s2009_s10  ;;  %p2014_p5 = scmp.lt.s32.totalorder %s2650_s29, %s2752_s3 }
 0x680   : > { %p2015_p7 = scmp.lt.s32.totalorder %s2013_s8, %s2009_s10 }
 0x681   : > { %p2011_p1 = pnand %p2010_p0, %p2224_p4 }
 0x682   : > { %p2016_p6 = por %p2015_p7, %p2014_p5 }
 0x683   : > { %p2012_p3 = pneg %p2011_p1 }
 0x685   : > { %p2017_p9 = pnand %p2016_p6, %p2012_p3 }
 0x687   : > { %2020 = shalt.err (!%p2017_p9)
}
 0x688   : > { %s2144_s7 = smov 64   ;;  %s2145_s9 = smov 4   ;;  %1452 = vst [vmem:[%s2271_s11 + $0x38] sm:$0xff] %v1208_v20  ;;  %1223 = vst [vmem:[#allocation2] sm:$0xff] %v1208_v20 }
 0x689   : > { %s2762_s12 = scalar_lea.sflag [#allocation6], %s2260_s15  ;;  %1222 = vst [vmem:[#allocation10] sm:$0xff] %v1221_v21  ;;  %s2763_s0 = sand.u32 1, %s2210_s24  }
 0x68a   : > { %1885 = dma.vmem_to_hbm [thread:$0]  (%p2224_p4), %s2653_s13, 512, %s2650_s29, %s2762_s12, %s2144_s7, %s2144_s7, %s2145_s9  }
 0x68b   : > { %s2686_s25 = scalar_lea.sflag [#allocation9], %s2763_s0  ;;  %s2021_s10 = scalar_lea.vmem %s2655_s27, 1024 }
 0x68c   : > { %p2022_p2 = scmp.ne.s32.totalorder %s2655_s27, %s2021_s10  ;;  %s2146_s17 = smov [#allocation8]  }
 0x68d   : > { %s2025_s21 = sshll.u32 %s2146_s17, 4  ;;  %s2026_s21 = int_to_ptr.vmem [resolvable:$false] %s2025_s21 }
 0x68e   : > { %p2023_p10 = pnand %p2022_p2, %p2224_p4  ;;  %s2027_s8 = scalar_lea.vmem %s2026_s21, 2048 }
 0x68f   : > { %p2028_p12 = scmp.lt.s32.totalorder %s2655_s27, %s2026_s21  ;;  %p2029_p13 = scmp.lt.s32.totalorder %s2027_s8, %s2021_s10 }
 0x690   : > { %p2024_p11 = pneg %p2023_p10 }
 0x691   : > { %p2030_p0 = por %p2029_p13, %p2028_p12 }
 0x693   : > { %p2031_p1 = pnand %p2030_p0, %p2024_p11 }
 0x695   : > { %2034 = shalt.err (!%p2031_p1)
}
 0x696   : > { %s2035_s15 = scalar_lea.hbm %s2644_s14, 1024  ;;  %s2039_s29 = scalar_lea.hbm %s2753_s4, 3072 }
 0x697   : > { %p2036_p3 = scmp.ne.s32.totalorder %s2644_s14, %s2035_s15  ;;  %p2040_p6 = scmp.lt.s32.totalorder %s2644_s14, %s2753_s4 }
 0x698   : > { %p2041_p9 = scmp.lt.s32.totalorder %s2039_s29, %s2035_s15 }
 0x699   : > { %p2037_p5 = pnand %p2036_p3, %p2224_p4 }
 0x69a   : > { %p2042_p2 = por %p2041_p9, %p2040_p6 }
 0x69b   : > { %p2038_p7 = pneg %p2037_p5 }
 0x69d   : > { %p2043_p10 = pnand %p2042_p2, %p2038_p7 }
 0x69f   : > { %2046 = shalt.err (!%p2043_p10)
}
 0x6a0   : > { %s2147_s12 = smov 128   ;;  %s2148_s0 = smov 8  }
 0x6a1   : > { %1886 = dma.vmem_to_hbm [thread:$0]  (%p2224_p4), %s2655_s27, 1024, %s2644_s14, %s2686_s25, %s2147_s12, %s2147_s12, %s2148_s0  }
 0x6a2   : > { %s2047_s10 = scalar_lea.vmem %s2658_s16, 128  ;;  %p2764_p12 = scmp.eq.s32.totalorder %s2210_s24, 2 }
 0x6a3   : > { %p2048_p11 = scmp.ne.s32.totalorder %s2658_s16, %s2047_s10  ;;  %p2054_p1 = scmp.lt.s32.totalorder %s2658_s16, %s2658_s16 }
 0x6a4   : > { %p2055_p3 = scmp.lt.s32.totalorder %s2047_s10, %s2047_s10 }
 0x6a5   : > { %p2049_p13 = pnand %p2048_p11, %p2764_p12 }
 0x6a6   : > { %p2056_p5 = por %p2055_p3, %p2054_p1 }
 0x6a7   : > { %p2050_p0 = pneg %p2049_p13 }
 0x6a9   : > { %p2057_p7 = pnand %p2056_p5, %p2050_p0 }
 0x6ab   : > { %2060 = shalt.err (!%p2057_p7)
}
 0x6ac   : > { %p2765_p6 = pmov %p2764_p12 }
 0x6ae   : > { %1888 = dma.vmem_to_hbm [thread:$0]  (%p2765_p6), %s2658_s16, 128, %s2754_s5, [#allocation9]  }
 0x6af   : > { %p2766_p4 = pmov %p2765_p6 }
 0x6b1   : > { %2100 = dma.done.wait (%p2766_p4), [#allocation9], 128   ;;  %p2767_p9 = pmov %p2766_p4 }
 0x6b3   : > { %2102 = vsyncadd (%p2767_p9), [#allocation9], 4294967168 }
 0x6b4 PF: > { %p1908_p2 = scmp.ge.s32.totalorder %s2133_s23, 2  ;;  %s1294_s28 = sand.u32 1, %s2113_s18  }
 0x6b5   : > { %s1295_s14 = scalar_lea.sflag [#allocation6], %s1294_s28 }
 0x6b6   : > { %p1898_p10 = pnand %p1908_p2, %p2233_p8 }
 0x6b8   : > { %p1899_p11 = pneg %p1898_p10 }
 0x6ba   : > { %2104 = dma.done.wait (%p1899_p11), %s1295_s14, 512  }
 0x6bb   : > { %2106 = vsyncadd (%p1899_p11), %s1295_s14, 4294966784  ;;  %s2768_s27 = sadd.s32 4294967294, %s2133_s23  }
 0x6bc   : > { %s1303_s16 = sand.u32 1, %s2768_s27  }
 0x6bd   : > { %s1304_s25 = scalar_lea.sflag [#allocation9], %s1303_s16 }
 0x6be   : > { %2108 = dma.done.wait (%p1899_p11), %s1304_s25, 1024  }
 0x6bf   : > { %2110 = vsyncadd (%p1899_p11), %s1304_s25, 4294966272  ;;  %s23_s23 = sadd.s32 1, %s2133_s23   ;;  %s2769_s18 = smov %s2117_s19 }
 0x6c0   : > { %p20_p12 = scmp.ge.s32.totalorder %s23_s23, 5   ;;  %s2770_s19 = smov %s2121_s20 }
 0x6c1   : > { %s2771_s20 = smov %s2239_s6  ;;  %s2772_s21 = smov %s2129_s22 }
 0x6c2   : > { %s2773_s22 = smov %s2775_s26  ;;  %22 = sbr.rel (!%p20_p12) target bundleno = 9 (0x9), region = 116 }
 0x6c7   :  { %1309 = vsyncpa [#allocation5], 1 }
 0x6c8   :  { %1311 = vsyncpa [#allocation5 + $0x1], 1 }
 0x6c9   :  { %1312 = vsyncpa [#allocation6], 1 }
 0x6ca   :  { %1314 = vsyncpa [#allocation6 + $0x1], 1 }
 0x6cb   :  { %1315 = vsyncpa [#allocation9], 1 }
 0x6cc   :  { %1317 = vsyncpa [#allocation9 + $0x1], 1 }

</bundles_post_ra>
